<compile_context>
chip_gen: v5e
topology: v5e:2x2
jax: 0.10.0
libtpu: 0.0.40
codegen_flags: <defaults>
</compile_context>

<pallas_src>
import functools

import numpy as np

import jax
import jax.numpy as jnp
from jax import lax
from jax.experimental import pallas as pl
from jax.experimental.pallas import tpu as pltpu

# --------------------------- config (small shapes) ---------------------------
BATCH = 2
IN_CHANNELS = 4
OUT_CHANNELS = 8
IMAGE_SIZE = 16                # >= kerel_split_thres (16) -> unfold branch
ATTN_KERNEL_SIZE = 3
ATTN_HIDDEN_SIZE = 32
NORM_SCALE = 0.1
IN_FEATURES = (IMAGE_SIZE // ATTN_KERNEL_SIZE) ** 2        # 25


# --------------------------- fused Pallas kernel ------------------------------
def _fused_attn_conv_kernel(keyT_ref, qry_ref, wkeyT_ref, wqry_ref, wdw_ref,
                            x1_ref, mask_ref, sel_ref, out_ref, vmat_ref, *,
                            width):
    """Everything-in-VMEM forward.

    keyT_ref  : (N*L, KK*C_in)        stride-k patches of x1, lane = (p, c_in)
    qry_ref   : (KK*C_out, N*L)       stride-k patches of query_conv(x2)
    wkeyT_ref : (N*Ha, N*L)           kron(eye(N), W_key)
    wqry_ref  : (N*L, N*Ha)           kron(eye(N), W_qry^T)
    wdw_ref   : (KK, C_in, 1)         depthwise value_conv taps
    x1_ref    : (C_in, N*HW)          x1 with batch folded into the lane axis
    mask_ref  : (KK, 1, N*HW)         border masks (zero-padding semantics)
    sel_ref   : (KK, 1, KK*C_in)      block-diag selectors, norm_scale/N folded in
    out_ref   : (N, C_out, HW)
    vmat_ref  : (KK*C_in, N*HW)       VMEM scratch for the stacked value rows
    """
    kk, c_in, _ = wdw_ref.shape
    k = int(round(kk ** 0.5))
    nb, c_out, hw = out_ref.shape
    total_lanes = x1_ref.shape[-1]                      # N*HW
    center = kk // 2                                    # (0,0) offset tap

    # ---- attention-kernel phase: 3 batched MXU matmuls ------------------------
    khT = jnp.dot(wkeyT_ref[...], keyT_ref[...],
                  preferred_element_type=jnp.float32)          # (N*Ha, KK*C_in)
    qh = jnp.dot(qry_ref[...], wqry_ref[...],
                 preferred_element_type=jnp.float32)           # (KK*C_out, N*Ha)
    a_full = jnp.dot(qh, khT,
                     preferred_element_type=jnp.float32)       # (KK*C_out, KK*C_in)

    # Block-diagonal extraction: aligned 8-sublane slices, lane-select constants
    # (selectors also carry the norm_scale / N factor, and sum over the batch is
    # already folded into the N*Ha contraction above == the .mean(0) of the spec).
    a = a_full[0:c_out, :] * sel_ref[0]
    for p in range(1, kk):
        a = a + a_full[p * c_out:(p + 1) * c_out, :] * sel_ref[p]   # (C_out, KK*C_in)

    # "softmax over everything": global max subtract, exp, global-sum normalize.
    e = jnp.exp(a - jnp.max(a))                                     # (C_out, KK*C_in)
    inv_total = 1.0 / jnp.sum(e)

    # ---- depthwise value_conv via roll + border mask (batches on lanes) -------
    x1 = x1_ref[...]                                                # (C_in, N*HW)
    value = wdw_ref[center] * x1                 # center tap: shift 0, mask == 1
    for q in range(kk):
        if q == center:
            continue
        d = (q // k - k // 2) * width + (q % k - k // 2)
        shifted = pltpu.roll(x1, (-d) % total_lanes, axis=1)
        value = value + wdw_ref[q] * (shifted * mask_ref[q])

    # ---- outer conv2d(value, attn_kernel): stack 9 shifted copies, 1 matmul ---
    for p in range(kk):
        if p == center:
            vmat_ref[p * c_in:(p + 1) * c_in, :] = value
        else:
            d = (p // k - k // 2) * width + (p % k - k // 2)
            shifted = pltpu.roll(value, (-d) % total_lanes, axis=1)
            vmat_ref[p * c_in:(p + 1) * c_in, :] = shifted * mask_ref[p]

    out_all = jnp.dot(e, vmat_ref[...],
                      preferred_element_type=jnp.float32) * inv_total  # (C_out, N*HW)
    for b in range(nb):
        out_ref[b] = out_all[:, b * hw:(b + 1) * hw]


# ------------------- parameter-dependent constants (hoisted) ------------------
def prepare_params(params, n, h, w):
    """Re-layouts that only depend on parameters / static shapes: run once."""
    k = ATTN_KERNEL_SIZE
    kk = k * k
    c_in = IN_CHANNELS

    eye_n = jnp.eye(n, dtype=jnp.float32)
    wkeyT = jnp.kron(eye_n, params["w_key_linear"])                     # (N*Ha, N*L)
    wqry = jnp.kron(eye_n, jnp.transpose(params["w_query_linear"]))     # (N*L, N*Ha)
    wdw = jnp.transpose(params["w_value_conv"].reshape(c_in, kk)).reshape(kk, c_in, 1)

    # Border masks: valid iff the shifted pixel stays inside the image (exactly
    # the zero-padding of both the depthwise conv and the outer conv).  Tiled
    # over the batch segments of the flattened lane axis.
    yy, xx = np.meshgrid(np.arange(h), np.arange(w), indexing="ij")
    mlist = []
    for p in range(kk):
        dy, dx = p // k - k // 2, p % k - k // 2
        valid = (yy + dy >= 0) & (yy + dy < h) & (xx + dx >= 0) & (xx + dx < w)
        mlist.append(valid.reshape(-1))
    base = np.stack(mlist).astype(np.float32)                           # (KK, HW)
    masks = jnp.asarray(np.tile(base, (1, n)).reshape(kk, 1, n * h * w))

    # Lane selectors for the block-diagonal score extraction (scale folded in).
    sel = np.zeros((kk, 1, kk * c_in), np.float32)
    for p in range(kk):
        sel[p, 0, p * c_in:(p + 1) * c_in] = NORM_SCALE / n

    return {"wkeyT": wkeyT, "wqry": wqry, "wqc": params["w_query_conv"],
            "wdw": wdw, "masks": masks, "sel": jnp.asarray(sel)}


# ---------------------------------- forward -----------------------------------
def attn_conv2d_forward(prep, x1, x2):
    n, c_in, h, w = x1.shape
    k = ATTN_KERNEL_SIZE
    c_out = OUT_CHANNELS
    kk = k * k
    l = (h // k) * (w // k)
    hw = h * w
    hs, ws = (h // k) * k, (w // k) * k

    # 1x1 query_conv applied wrapper-side (tiny einsum) so the kernel only sees
    # one batched linear per operand.
    q_x2 = jnp.einsum("oc,nchw->nohw", prep["wqc"], x2)

    # Stride-k patches:  key as (N*L, KK*C_in),  query as (KK*C_out, N*L).
    xk = x1[:, :, :hs, :ws].reshape(n, c_in, h // k, k, w // k, k)
    keyT = jnp.transpose(xk, (0, 2, 4, 3, 5, 1)).reshape(n * l, kk * c_in)
    xq = q_x2[:, :, :hs, :ws].reshape(n, c_out, h // k, k, w // k, k)
    qry = jnp.transpose(xq, (3, 5, 1, 0, 2, 4)).reshape(kk * c_out, n * l)

    # x1 with batch folded into the lane axis for the value / output phase.
    x1cat = jnp.transpose(x1, (1, 0, 2, 3)).reshape(c_in, n * hw)

    out = pl.pallas_call(
        functools.partial(_fused_attn_conv_kernel, width=w),
        out_shape=jax.ShapeDtypeStruct((n, c_out, hw), jnp.float32),
        scratch_shapes=[pltpu.VMEM((kk * c_in, n * hw), jnp.float32)],
    )(keyT, qry, prep["wkeyT"], prep["wqry"], prep["wdw"], x1cat,
      prep["masks"], prep["sel"])
    return out.reshape(n, c_out, h, w)


# ------------------------- pure-JAX reference (check) -------------------------
def unfold(x, k, stride, padding=0):
    """PyTorch nn.Unfold semantics: (N,C,H,W) -> (N, C*k*k, L)."""
    n, c, h, w = x.shape
    if padding:
        x = jnp.pad(x, ((0, 0), (0, 0), (padding, padding), (padding, padding)))
        h += 2 * padding
        w += 2 * padding
    ho = (h - k) // stride + 1
    wo = (w - k) // stride + 1
    cols = []
    for ki in range(k):
        for kj in range(k):
            patch = x[:, :, ki:ki + stride * ho:stride, kj:kj + stride * wo:stride]
            cols.append(patch.reshape(n, c, ho * wo))
    col = jnp.stack(cols, axis=2)
    return col.reshape(n, c * k * k, ho * wo)


def reference_forward(params, x1, x2):
    n, c_in, _, _ = x1.shape
    k, ha, c_out = ATTN_KERNEL_SIZE, ATTN_HIDDEN_SIZE, OUT_CHANNELS
    dn = ("NCHW", "OIHW", "NCHW")
    q_x2 = lax.conv_general_dilated(x2, params["w_query_conv"][:, :, None, None],
                                    (1, 1), "VALID", dimension_numbers=dn)
    key_u = unfold(x1, k, stride=k)
    qry_u = unfold(q_x2, k, stride=k)
    key = jnp.einsum("nfl,hl->nfh", key_u, params["w_key_linear"]).reshape(n, c_in, k * k, ha)
    qry = jnp.einsum("nfl,hl->nfh", qry_u, params["w_query_linear"]).reshape(n, c_out, k * k, ha)
    attn = jnp.einsum("niph,noph->oip", key, qry) / n
    attn = NORM_SCALE * attn
    attn = jnp.exp(attn - jnp.max(attn))
    attn = (attn / jnp.sum(attn)).reshape(c_out, c_in, k, k)
    value = lax.conv_general_dilated(x1, params["w_value_conv"], (1, 1),
                                     [(k // 2, k // 2)] * 2,
                                     feature_group_count=c_in, dimension_numbers=dn)
    return lax.conv_general_dilated(value, attn, (1, 1),
                                    [(k // 2, k // 2)] * 2, dimension_numbers=dn)


if __name__ == "__main__":
    key0 = jax.random.PRNGKey(0)
    ks = jax.random.split(key0, 6)
    bound = (3.0 / (ATTN_HIDDEN_SIZE * IN_CHANNELS * IN_FEATURES * IN_FEATURES
                    * ATTN_KERNEL_SIZE * ATTN_KERNEL_SIZE)) ** 0.25
    params = {
        "w_key_linear": jax.random.uniform(ks[0], (ATTN_HIDDEN_SIZE, IN_FEATURES),
                                           jnp.float32, -bound, bound),
        "w_query_linear": jax.random.uniform(ks[1], (ATTN_HIDDEN_SIZE, IN_FEATURES),
                                             jnp.float32, -bound, bound),
        "w_query_conv": jax.random.uniform(ks[2], (OUT_CHANNELS, IN_CHANNELS),
                                           jnp.float32, -0.5, 0.5),
        "w_value_conv": jax.random.uniform(
            ks[3], (IN_CHANNELS, 1, ATTN_KERNEL_SIZE, ATTN_KERNEL_SIZE),
            jnp.float32, -1.0 / 3.0, 1.0 / 3.0),
    }
    x1 = jax.random.normal(ks[4], (BATCH, IN_CHANNELS, IMAGE_SIZE, IMAGE_SIZE), jnp.float32)
    x2 = jax.random.normal(ks[5], (BATCH, IN_CHANNELS, IMAGE_SIZE, IMAGE_SIZE), jnp.float32)

    # Parameter-only re-layouts, computed once (outside the per-step jit).
    prep = prepare_params(params, BATCH, IMAGE_SIZE, IMAGE_SIZE)

    fwd = jax.jit(attn_conv2d_forward)
    out = jax.block_until_ready(fwd(prep, x1, x2))

    assert out.shape == (BATCH, OUT_CHANNELS, IMAGE_SIZE, IMAGE_SIZE), out.shape
    assert bool(jnp.isfinite(out).all())
    ref = reference_forward(params, x1, x2)
    assert jnp.allclose(out, ref, rtol=1e-2, atol=1e-3), float(jnp.max(jnp.abs(out - ref)))
    print("KERNEL_OK")
</pallas_src>

<mosaic_0001>
module attributes {stable_mosaic.version = 11 : i64} {
  func.func @_fused_attn_conv_kernel(%arg0: memref<50x36xf32, #tpu.memory_space<vmem>>, %arg1: memref<72x50xf32, #tpu.memory_space<vmem>>, %arg2: memref<64x50xf32, #tpu.memory_space<vmem>>, %arg3: memref<50x64xf32, #tpu.memory_space<vmem>>, %arg4: memref<9x4x1xf32, #tpu.memory_space<vmem>>, %arg5: memref<4x512xf32, #tpu.memory_space<vmem>>, %arg6: memref<9x1x512xf32, #tpu.memory_space<vmem>>, %arg7: memref<9x1x36xf32, #tpu.memory_space<vmem>>, %arg8: memref<2x8x256xf32, #tpu.memory_space<vmem>>, %arg9: memref<36x512xf32, #tpu.memory_space<vmem>>) attributes {dimension_semantics = [], scalar_prefetch = 0 : i64, scratch_operands = 1 : i64, tpu.core_type = #tpu.core_type<tc>} {
    %c0 = arith.constant 0 : index
    %c0_0 = arith.constant 0 : index
    %0 = vector.load %arg2[%c0, %c0_0] : memref<64x50xf32, #tpu.memory_space<vmem>>, vector<64x50xf32>
    %c0_1 = arith.constant 0 : index
    %c0_2 = arith.constant 0 : index
    %1 = vector.load %arg0[%c0_1, %c0_2] : memref<50x36xf32, #tpu.memory_space<vmem>>, vector<50x36xf32>
    %cst = arith.constant dense<0.000000e+00> : vector<64x36xf32>
    %2 = tpu.matmul %0, %1, %cst {dimension_numbers = #tpu.dot_dimension_numbers<[1], [0], [0], [1], [0, 0, 1, 1], [], []>} : vector<64x50xf32>, vector<50x36xf32>, vector<64x36xf32> -> vector<64x36xf32>
    %c0_3 = arith.constant 0 : index
    %c0_4 = arith.constant 0 : index
    %3 = vector.load %arg1[%c0_3, %c0_4] : memref<72x50xf32, #tpu.memory_space<vmem>>, vector<72x50xf32>
    %c0_5 = arith.constant 0 : index
    %c0_6 = arith.constant 0 : index
    %4 = vector.load %arg3[%c0_5, %c0_6] : memref<50x64xf32, #tpu.memory_space<vmem>>, vector<50x64xf32>
    %cst_7 = arith.constant dense<0.000000e+00> : vector<72x64xf32>
    %5 = tpu.matmul %3, %4, %cst_7 {dimension_numbers = #tpu.dot_dimension_numbers<[1], [0], [0], [1], [0, 0, 1, 1], [], []>} : vector<72x50xf32>, vector<50x64xf32>, vector<72x64xf32> -> vector<72x64xf32>
    %cst_8 = arith.constant dense<0.000000e+00> : vector<72x36xf32>
    %6 = tpu.matmul %5, %2, %cst_8 {dimension_numbers = #tpu.dot_dimension_numbers<[1], [0], [0], [1], [0, 0, 1, 1], [], []>} : vector<72x64xf32>, vector<64x36xf32>, vector<72x36xf32> -> vector<72x36xf32>
    %7 = vector.extract_strided_slice %6 {offsets = [0, 0], sizes = [8, 36], strides = [1, 1]} : vector<72x36xf32> to vector<8x36xf32>
    %c0_9 = arith.constant 0 : index
    %c0_10 = arith.constant 0 : index
    %c0_11 = arith.constant 0 : index
    %8 = vector.load %arg7[%c0_9, %c0_10, %c0_11] : memref<9x1x36xf32, #tpu.memory_space<vmem>>, vector<1x1x36xf32>
    %9 = vector.shape_cast %8 : vector<1x1x36xf32> to vector<1x36xf32>
    %10 = vector.broadcast %9 : vector<1x36xf32> to vector<8x36xf32>
    %11 = arith.mulf %7, %10 : vector<8x36xf32>
    %12 = vector.extract_strided_slice %6 {offsets = [8, 0], sizes = [8, 36], strides = [1, 1]} : vector<72x36xf32> to vector<8x36xf32>
    %c1 = arith.constant 1 : index
    %c0_12 = arith.constant 0 : index
    %c0_13 = arith.constant 0 : index
    %13 = vector.load %arg7[%c1, %c0_12, %c0_13] : memref<9x1x36xf32, #tpu.memory_space<vmem>>, vector<1x1x36xf32>
    %14 = vector.shape_cast %13 : vector<1x1x36xf32> to vector<1x36xf32>
    %15 = vector.broadcast %14 : vector<1x36xf32> to vector<8x36xf32>
    %16 = arith.mulf %12, %15 : vector<8x36xf32>
    %17 = arith.addf %11, %16 : vector<8x36xf32>
    %18 = vector.extract_strided_slice %6 {offsets = [16, 0], sizes = [8, 36], strides = [1, 1]} : vector<72x36xf32> to vector<8x36xf32>
    %c2 = arith.constant 2 : index
    %c0_14 = arith.constant 0 : index
    %c0_15 = arith.constant 0 : index
    %19 = vector.load %arg7[%c2, %c0_14, %c0_15] : memref<9x1x36xf32, #tpu.memory_space<vmem>>, vector<1x1x36xf32>
    %20 = vector.shape_cast %19 : vector<1x1x36xf32> to vector<1x36xf32>
    %21 = vector.broadcast %20 : vector<1x36xf32> to vector<8x36xf32>
    %22 = arith.mulf %18, %21 : vector<8x36xf32>
    %23 = arith.addf %17, %22 : vector<8x36xf32>
    %24 = vector.extract_strided_slice %6 {offsets = [24, 0], sizes = [8, 36], strides = [1, 1]} : vector<72x36xf32> to vector<8x36xf32>
    %c3 = arith.constant 3 : index
    %c0_16 = arith.constant 0 : index
    %c0_17 = arith.constant 0 : index
    %25 = vector.load %arg7[%c3, %c0_16, %c0_17] : memref<9x1x36xf32, #tpu.memory_space<vmem>>, vector<1x1x36xf32>
    %26 = vector.shape_cast %25 : vector<1x1x36xf32> to vector<1x36xf32>
    %27 = vector.broadcast %26 : vector<1x36xf32> to vector<8x36xf32>
    %28 = arith.mulf %24, %27 : vector<8x36xf32>
    %29 = arith.addf %23, %28 : vector<8x36xf32>
    %30 = vector.extract_strided_slice %6 {offsets = [32, 0], sizes = [8, 36], strides = [1, 1]} : vector<72x36xf32> to vector<8x36xf32>
    %c4 = arith.constant 4 : index
    %c0_18 = arith.constant 0 : index
    %c0_19 = arith.constant 0 : index
    %31 = vector.load %arg7[%c4, %c0_18, %c0_19] : memref<9x1x36xf32, #tpu.memory_space<vmem>>, vector<1x1x36xf32>
    %32 = vector.shape_cast %31 : vector<1x1x36xf32> to vector<1x36xf32>
    %33 = vector.broadcast %32 : vector<1x36xf32> to vector<8x36xf32>
    %34 = arith.mulf %30, %33 : vector<8x36xf32>
    %35 = arith.addf %29, %34 : vector<8x36xf32>
    %36 = vector.extract_strided_slice %6 {offsets = [40, 0], sizes = [8, 36], strides = [1, 1]} : vector<72x36xf32> to vector<8x36xf32>
    %c5 = arith.constant 5 : index
    %c0_20 = arith.constant 0 : index
    %c0_21 = arith.constant 0 : index
    %37 = vector.load %arg7[%c5, %c0_20, %c0_21] : memref<9x1x36xf32, #tpu.memory_space<vmem>>, vector<1x1x36xf32>
    %38 = vector.shape_cast %37 : vector<1x1x36xf32> to vector<1x36xf32>
    %39 = vector.broadcast %38 : vector<1x36xf32> to vector<8x36xf32>
    %40 = arith.mulf %36, %39 : vector<8x36xf32>
    %41 = arith.addf %35, %40 : vector<8x36xf32>
    %42 = vector.extract_strided_slice %6 {offsets = [48, 0], sizes = [8, 36], strides = [1, 1]} : vector<72x36xf32> to vector<8x36xf32>
    %c6 = arith.constant 6 : index
    %c0_22 = arith.constant 0 : index
    %c0_23 = arith.constant 0 : index
    %43 = vector.load %arg7[%c6, %c0_22, %c0_23] : memref<9x1x36xf32, #tpu.memory_space<vmem>>, vector<1x1x36xf32>
    %44 = vector.shape_cast %43 : vector<1x1x36xf32> to vector<1x36xf32>
    %45 = vector.broadcast %44 : vector<1x36xf32> to vector<8x36xf32>
    %46 = arith.mulf %42, %45 : vector<8x36xf32>
    %47 = arith.addf %41, %46 : vector<8x36xf32>
    %48 = vector.extract_strided_slice %6 {offsets = [56, 0], sizes = [8, 36], strides = [1, 1]} : vector<72x36xf32> to vector<8x36xf32>
    %c7 = arith.constant 7 : index
    %c0_24 = arith.constant 0 : index
    %c0_25 = arith.constant 0 : index
    %49 = vector.load %arg7[%c7, %c0_24, %c0_25] : memref<9x1x36xf32, #tpu.memory_space<vmem>>, vector<1x1x36xf32>
    %50 = vector.shape_cast %49 : vector<1x1x36xf32> to vector<1x36xf32>
    %51 = vector.broadcast %50 : vector<1x36xf32> to vector<8x36xf32>
    %52 = arith.mulf %48, %51 : vector<8x36xf32>
    %53 = arith.addf %47, %52 : vector<8x36xf32>
    %54 = vector.extract_strided_slice %6 {offsets = [64, 0], sizes = [8, 36], strides = [1, 1]} : vector<72x36xf32> to vector<8x36xf32>
    %c8 = arith.constant 8 : index
    %c0_26 = arith.constant 0 : index
    %c0_27 = arith.constant 0 : index
    %55 = vector.load %arg7[%c8, %c0_26, %c0_27] : memref<9x1x36xf32, #tpu.memory_space<vmem>>, vector<1x1x36xf32>
    %56 = vector.shape_cast %55 : vector<1x1x36xf32> to vector<1x36xf32>
    %57 = vector.broadcast %56 : vector<1x36xf32> to vector<8x36xf32>
    %58 = arith.mulf %54, %57 : vector<8x36xf32>
    %59 = arith.addf %53, %58 : vector<8x36xf32>
    %60 = vector.shape_cast %59 : vector<8x36xf32> to vector<1x8x36xf32>
    %cst_28 = arith.constant dense<0xFF800000> : vector<1xf32>
    %61 = vector.multi_reduction <maximumf>, %60, %cst_28 [1, 2] : vector<1x8x36xf32> to vector<1xf32>
    %62 = vector.shape_cast %61 : vector<1xf32> to vector<1x1x1xf32>
    %63 = vector.extract %62[0, 0, 0] : f32 from vector<1x1x1xf32>
    %64 = vector.broadcast %63 : f32 to vector<8x36xf32>
    %65 = arith.subf %59, %64 : vector<8x36xf32>
    %66 = math.exp %65 : vector<8x36xf32>
    %67 = vector.shape_cast %66 : vector<8x36xf32> to vector<1x8x36xf32>
    %cst_29 = arith.constant dense<0.000000e+00> : vector<1xf32>
    %68 = vector.multi_reduction <add>, %67, %cst_29 [1, 2] : vector<1x8x36xf32> to vector<1xf32>
    %69 = vector.shape_cast %68 : vector<1xf32> to vector<1x1x1xf32>
    %70 = vector.extract %69[0, 0, 0] : f32 from vector<1x1x1xf32>
    %cst_30 = arith.constant 1.000000e+00 : f32
    %71 = arith.divf %cst_30, %70 : f32
    %c0_31 = arith.constant 0 : index
    %c0_32 = arith.constant 0 : index
    %72 = vector.load %arg5[%c0_31, %c0_32] : memref<4x512xf32, #tpu.memory_space<vmem>>, vector<4x512xf32>
    %c4_33 = arith.constant 4 : index
    %c0_34 = arith.constant 0 : index
    %c0_35 = arith.constant 0 : index
    %73 = vector.load %arg4[%c4_33, %c0_34, %c0_35] : memref<9x4x1xf32, #tpu.memory_space<vmem>>, vector<1x4x1xf32>
    %74 = vector.shape_cast %73 : vector<1x4x1xf32> to vector<4x1xf32>
    %75 = vector.broadcast %74 : vector<4x1xf32> to vector<4x512xf32>
    %76 = arith.mulf %75, %72 : vector<4x512xf32>
    %c17_i32 = arith.constant 17 : i32
    %77 = tpu.dynamic_rotate %72 by %c17_i32 dim 1 : vector<4x512xf32>, i32 -> vector<4x512xf32>
    %c0_36 = arith.constant 0 : index
    %c0_37 = arith.constant 0 : index
    %c0_38 = arith.constant 0 : index
    %78 = vector.load %arg4[%c0_36, %c0_37, %c0_38] : memref<9x4x1xf32, #tpu.memory_space<vmem>>, vector<1x4x1xf32>
    %79 = vector.shape_cast %78 : vector<1x4x1xf32> to vector<4x1xf32>
    %c0_39 = arith.constant 0 : index
    %c0_40 = arith.constant 0 : index
    %c0_41 = arith.constant 0 : index
    %80 = vector.load %arg6[%c0_39, %c0_40, %c0_41] : memref<9x1x512xf32, #tpu.memory_space<vmem>>, vector<1x1x512xf32>
    %81 = vector.shape_cast %80 : vector<1x1x512xf32> to vector<1x512xf32>
    %82 = vector.broadcast %81 : vector<1x512xf32> to vector<4x512xf32>
    %83 = arith.mulf %77, %82 : vector<4x512xf32>
    %84 = vector.broadcast %79 : vector<4x1xf32> to vector<4x512xf32>
    %85 = arith.mulf %84, %83 : vector<4x512xf32>
    %86 = arith.addf %76, %85 : vector<4x512xf32>
    %c16_i32 = arith.constant 16 : i32
    %87 = tpu.dynamic_rotate %72 by %c16_i32 dim 1 : vector<4x512xf32>, i32 -> vector<4x512xf32>
    %c1_42 = arith.constant 1 : index
    %c0_43 = arith.constant 0 : index
    %c0_44 = arith.constant 0 : index
    %88 = vector.load %arg4[%c1_42, %c0_43, %c0_44] : memref<9x4x1xf32, #tpu.memory_space<vmem>>, vector<1x4x1xf32>
    %89 = vector.shape_cast %88 : vector<1x4x1xf32> to vector<4x1xf32>
    %c1_45 = arith.constant 1 : index
    %c0_46 = arith.constant 0 : index
    %c0_47 = arith.constant 0 : index
    %90 = vector.load %arg6[%c1_45, %c0_46, %c0_47] : memref<9x1x512xf32, #tpu.memory_space<vmem>>, vector<1x1x512xf32>
    %91 = vector.shape_cast %90 : vector<1x1x512xf32> to vector<1x512xf32>
    %92 = vector.broadcast %91 : vector<1x512xf32> to vector<4x512xf32>
    %93 = arith.mulf %87, %92 : vector<4x512xf32>
    %94 = vector.broadcast %89 : vector<4x1xf32> to vector<4x512xf32>
    %95 = arith.mulf %94, %93 : vector<4x512xf32>
    %96 = arith.addf %86, %95 : vector<4x512xf32>
    %c15_i32 = arith.constant 15 : i32
    %97 = tpu.dynamic_rotate %72 by %c15_i32 dim 1 : vector<4x512xf32>, i32 -> vector<4x512xf32>
    %c2_48 = arith.constant 2 : index
    %c0_49 = arith.constant 0 : index
    %c0_50 = arith.constant 0 : index
    %98 = vector.load %arg4[%c2_48, %c0_49, %c0_50] : memref<9x4x1xf32, #tpu.memory_space<vmem>>, vector<1x4x1xf32>
    %99 = vector.shape_cast %98 : vector<1x4x1xf32> to vector<4x1xf32>
    %c2_51 = arith.constant 2 : index
    %c0_52 = arith.constant 0 : index
    %c0_53 = arith.constant 0 : index
    %100 = vector.load %arg6[%c2_51, %c0_52, %c0_53] : memref<9x1x512xf32, #tpu.memory_space<vmem>>, vector<1x1x512xf32>
    %101 = vector.shape_cast %100 : vector<1x1x512xf32> to vector<1x512xf32>
    %102 = vector.broadcast %101 : vector<1x512xf32> to vector<4x512xf32>
    %103 = arith.mulf %97, %102 : vector<4x512xf32>
    %104 = vector.broadcast %99 : vector<4x1xf32> to vector<4x512xf32>
    %105 = arith.mulf %104, %103 : vector<4x512xf32>
    %106 = arith.addf %96, %105 : vector<4x512xf32>
    %c1_i32 = arith.constant 1 : i32
    %107 = tpu.dynamic_rotate %72 by %c1_i32 dim 1 : vector<4x512xf32>, i32 -> vector<4x512xf32>
    %c3_54 = arith.constant 3 : index
    %c0_55 = arith.constant 0 : index
    %c0_56 = arith.constant 0 : index
    %108 = vector.load %arg4[%c3_54, %c0_55, %c0_56] : memref<9x4x1xf32, #tpu.memory_space<vmem>>, vector<1x4x1xf32>
    %109 = vector.shape_cast %108 : vector<1x4x1xf32> to vector<4x1xf32>
    %c3_57 = arith.constant 3 : index
    %c0_58 = arith.constant 0 : index
    %c0_59 = arith.constant 0 : index
    %110 = vector.load %arg6[%c3_57, %c0_58, %c0_59] : memref<9x1x512xf32, #tpu.memory_space<vmem>>, vector<1x1x512xf32>
    %111 = vector.shape_cast %110 : vector<1x1x512xf32> to vector<1x512xf32>
    %112 = vector.broadcast %111 : vector<1x512xf32> to vector<4x512xf32>
    %113 = arith.mulf %107, %112 : vector<4x512xf32>
    %114 = vector.broadcast %109 : vector<4x1xf32> to vector<4x512xf32>
    %115 = arith.mulf %114, %113 : vector<4x512xf32>
    %116 = arith.addf %106, %115 : vector<4x512xf32>
    %c511_i32 = arith.constant 511 : i32
    %117 = tpu.dynamic_rotate %72 by %c511_i32 dim 1 : vector<4x512xf32>, i32 -> vector<4x512xf32>
    %c5_60 = arith.constant 5 : index
    %c0_61 = arith.constant 0 : index
    %c0_62 = arith.constant 0 : index
    %118 = vector.load %arg4[%c5_60, %c0_61, %c0_62] : memref<9x4x1xf32, #tpu.memory_space<vmem>>, vector<1x4x1xf32>
    %119 = vector.shape_cast %118 : vector<1x4x1xf32> to vector<4x1xf32>
    %c5_63 = arith.constant 5 : index
    %c0_64 = arith.constant 0 : index
    %c0_65 = arith.constant 0 : index
    %120 = vector.load %arg6[%c5_63, %c0_64, %c0_65] : memref<9x1x512xf32, #tpu.memory_space<vmem>>, vector<1x1x512xf32>
    %121 = vector.shape_cast %120 : vector<1x1x512xf32> to vector<1x512xf32>
    %122 = vector.broadcast %121 : vector<1x512xf32> to vector<4x512xf32>
    %123 = arith.mulf %117, %122 : vector<4x512xf32>
    %124 = vector.broadcast %119 : vector<4x1xf32> to vector<4x512xf32>
    %125 = arith.mulf %124, %123 : vector<4x512xf32>
    %126 = arith.addf %116, %125 : vector<4x512xf32>
    %c497_i32 = arith.constant 497 : i32
    %127 = tpu.dynamic_rotate %72 by %c497_i32 dim 1 : vector<4x512xf32>, i32 -> vector<4x512xf32>
    %c6_66 = arith.constant 6 : index
    %c0_67 = arith.constant 0 : index
    %c0_68 = arith.constant 0 : index
    %128 = vector.load %arg4[%c6_66, %c0_67, %c0_68] : memref<9x4x1xf32, #tpu.memory_space<vmem>>, vector<1x4x1xf32>
    %129 = vector.shape_cast %128 : vector<1x4x1xf32> to vector<4x1xf32>
    %c6_69 = arith.constant 6 : index
    %c0_70 = arith.constant 0 : index
    %c0_71 = arith.constant 0 : index
    %130 = vector.load %arg6[%c6_69, %c0_70, %c0_71] : memref<9x1x512xf32, #tpu.memory_space<vmem>>, vector<1x1x512xf32>
    %131 = vector.shape_cast %130 : vector<1x1x512xf32> to vector<1x512xf32>
    %132 = vector.broadcast %131 : vector<1x512xf32> to vector<4x512xf32>
    %133 = arith.mulf %127, %132 : vector<4x512xf32>
    %134 = vector.broadcast %129 : vector<4x1xf32> to vector<4x512xf32>
    %135 = arith.mulf %134, %133 : vector<4x512xf32>
    %136 = arith.addf %126, %135 : vector<4x512xf32>
    %c496_i32 = arith.constant 496 : i32
    %137 = tpu.dynamic_rotate %72 by %c496_i32 dim 1 : vector<4x512xf32>, i32 -> vector<4x512xf32>
    %c7_72 = arith.constant 7 : index
    %c0_73 = arith.constant 0 : index
    %c0_74 = arith.constant 0 : index
    %138 = vector.load %arg4[%c7_72, %c0_73, %c0_74] : memref<9x4x1xf32, #tpu.memory_space<vmem>>, vector<1x4x1xf32>
    %139 = vector.shape_cast %138 : vector<1x4x1xf32> to vector<4x1xf32>
    %c7_75 = arith.constant 7 : index
    %c0_76 = arith.constant 0 : index
    %c0_77 = arith.constant 0 : index
    %140 = vector.load %arg6[%c7_75, %c0_76, %c0_77] : memref<9x1x512xf32, #tpu.memory_space<vmem>>, vector<1x1x512xf32>
    %141 = vector.shape_cast %140 : vector<1x1x512xf32> to vector<1x512xf32>
    %142 = vector.broadcast %141 : vector<1x512xf32> to vector<4x512xf32>
    %143 = arith.mulf %137, %142 : vector<4x512xf32>
    %144 = vector.broadcast %139 : vector<4x1xf32> to vector<4x512xf32>
    %145 = arith.mulf %144, %143 : vector<4x512xf32>
    %146 = arith.addf %136, %145 : vector<4x512xf32>
    %c495_i32 = arith.constant 495 : i32
    %147 = tpu.dynamic_rotate %72 by %c495_i32 dim 1 : vector<4x512xf32>, i32 -> vector<4x512xf32>
    %c8_78 = arith.constant 8 : index
    %c0_79 = arith.constant 0 : index
    %c0_80 = arith.constant 0 : index
    %148 = vector.load %arg4[%c8_78, %c0_79, %c0_80] : memref<9x4x1xf32, #tpu.memory_space<vmem>>, vector<1x4x1xf32>
    %149 = vector.shape_cast %148 : vector<1x4x1xf32> to vector<4x1xf32>
    %c8_81 = arith.constant 8 : index
    %c0_82 = arith.constant 0 : index
    %c0_83 = arith.constant 0 : index
    %150 = vector.load %arg6[%c8_81, %c0_82, %c0_83] : memref<9x1x512xf32, #tpu.memory_space<vmem>>, vector<1x1x512xf32>
    %151 = vector.shape_cast %150 : vector<1x1x512xf32> to vector<1x512xf32>
    %152 = vector.broadcast %151 : vector<1x512xf32> to vector<4x512xf32>
    %153 = arith.mulf %147, %152 : vector<4x512xf32>
    %154 = vector.broadcast %149 : vector<4x1xf32> to vector<4x512xf32>
    %155 = arith.mulf %154, %153 : vector<4x512xf32>
    %156 = arith.addf %146, %155 : vector<4x512xf32>
    %c17_i32_84 = arith.constant 17 : i32
    %157 = tpu.dynamic_rotate %156 by %c17_i32_84 dim 1 : vector<4x512xf32>, i32 -> vector<4x512xf32>
    %c0_85 = arith.constant 0 : index
    %c0_86 = arith.constant 0 : index
    %c0_87 = arith.constant 0 : index
    %158 = vector.load %arg6[%c0_85, %c0_86, %c0_87] : memref<9x1x512xf32, #tpu.memory_space<vmem>>, vector<1x1x512xf32>
    %159 = vector.shape_cast %158 : vector<1x1x512xf32> to vector<1x512xf32>
    %160 = vector.broadcast %159 : vector<1x512xf32> to vector<4x512xf32>
    %161 = arith.mulf %157, %160 : vector<4x512xf32>
    %c0_88 = arith.constant 0 : index
    %c0_89 = arith.constant 0 : index
    %162 = vector.load %arg9[%c0_88, %c0_89] : memref<36x512xf32, #tpu.memory_space<vmem>>, vector<4x512xf32>
    tpu.vector_store %arg9[%c0_88, %c0_89], %161 {strides = array<i32>} : memref<36x512xf32, #tpu.memory_space<vmem>>, vector<4x512xf32>,
    %c16_i32_90 = arith.constant 16 : i32
    %163 = tpu.dynamic_rotate %156 by %c16_i32_90 dim 1 : vector<4x512xf32>, i32 -> vector<4x512xf32>
    %c1_91 = arith.constant 1 : index
    %c0_92 = arith.constant 0 : index
    %c0_93 = arith.constant 0 : index
    %164 = vector.load %arg6[%c1_91, %c0_92, %c0_93] : memref<9x1x512xf32, #tpu.memory_space<vmem>>, vector<1x1x512xf32>
    %165 = vector.shape_cast %164 : vector<1x1x512xf32> to vector<1x512xf32>
    %166 = vector.broadcast %165 : vector<1x512xf32> to vector<4x512xf32>
    %167 = arith.mulf %163, %166 : vector<4x512xf32>
    %c4_94 = arith.constant 4 : index
    %c0_95 = arith.constant 0 : index
    %168 = vector.load %arg9[%c4_94, %c0_95] : memref<36x512xf32, #tpu.memory_space<vmem>>, vector<4x512xf32>
    tpu.vector_store %arg9[%c4_94, %c0_95], %167 {strides = array<i32>} : memref<36x512xf32, #tpu.memory_space<vmem>>, vector<4x512xf32>,
    %c15_i32_96 = arith.constant 15 : i32
    %169 = tpu.dynamic_rotate %156 by %c15_i32_96 dim 1 : vector<4x512xf32>, i32 -> vector<4x512xf32>
    %c2_97 = arith.constant 2 : index
    %c0_98 = arith.constant 0 : index
    %c0_99 = arith.constant 0 : index
    %170 = vector.load %arg6[%c2_97, %c0_98, %c0_99] : memref<9x1x512xf32, #tpu.memory_space<vmem>>, vector<1x1x512xf32>
    %171 = vector.shape_cast %170 : vector<1x1x512xf32> to vector<1x512xf32>
    %172 = vector.broadcast %171 : vector<1x512xf32> to vector<4x512xf32>
    %173 = arith.mulf %169, %172 : vector<4x512xf32>
    %c8_100 = arith.constant 8 : index
    %c0_101 = arith.constant 0 : index
    %174 = vector.load %arg9[%c8_100, %c0_101] : memref<36x512xf32, #tpu.memory_space<vmem>>, vector<4x512xf32>
    tpu.vector_store %arg9[%c8_100, %c0_101], %173 {strides = array<i32>} : memref<36x512xf32, #tpu.memory_space<vmem>>, vector<4x512xf32>,
    %c1_i32_102 = arith.constant 1 : i32
    %175 = tpu.dynamic_rotate %156 by %c1_i32_102 dim 1 : vector<4x512xf32>, i32 -> vector<4x512xf32>
    %c3_103 = arith.constant 3 : index
    %c0_104 = arith.constant 0 : index
    %c0_105 = arith.constant 0 : index
    %176 = vector.load %arg6[%c3_103, %c0_104, %c0_105] : memref<9x1x512xf32, #tpu.memory_space<vmem>>, vector<1x1x512xf32>
    %177 = vector.shape_cast %176 : vector<1x1x512xf32> to vector<1x512xf32>
    %178 = vector.broadcast %177 : vector<1x512xf32> to vector<4x512xf32>
    %179 = arith.mulf %175, %178 : vector<4x512xf32>
    %c12 = arith.constant 12 : index
    %c0_106 = arith.constant 0 : index
    %180 = vector.load %arg9[%c12, %c0_106] : memref<36x512xf32, #tpu.memory_space<vmem>>, vector<4x512xf32>
    tpu.vector_store %arg9[%c12, %c0_106], %179 {strides = array<i32>} : memref<36x512xf32, #tpu.memory_space<vmem>>, vector<4x512xf32>,
    %c16 = arith.constant 16 : index
    %c0_107 = arith.constant 0 : index
    %181 = vector.load %arg9[%c16, %c0_107] : memref<36x512xf32, #tpu.memory_space<vmem>>, vector<4x512xf32>
    tpu.vector_store %arg9[%c16, %c0_107], %156 {strides = array<i32>} : memref<36x512xf32, #tpu.memory_space<vmem>>, vector<4x512xf32>,
    %c511_i32_108 = arith.constant 511 : i32
    %182 = tpu.dynamic_rotate %156 by %c511_i32_108 dim 1 : vector<4x512xf32>, i32 -> vector<4x512xf32>
    %c5_109 = arith.constant 5 : index
    %c0_110 = arith.constant 0 : index
    %c0_111 = arith.constant 0 : index
    %183 = vector.load %arg6[%c5_109, %c0_110, %c0_111] : memref<9x1x512xf32, #tpu.memory_space<vmem>>, vector<1x1x512xf32>
    %184 = vector.shape_cast %183 : vector<1x1x512xf32> to vector<1x512xf32>
    %185 = vector.broadcast %184 : vector<1x512xf32> to vector<4x512xf32>
    %186 = arith.mulf %182, %185 : vector<4x512xf32>
    %c20 = arith.constant 20 : index
    %c0_112 = arith.constant 0 : index
    %187 = vector.load %arg9[%c20, %c0_112] : memref<36x512xf32, #tpu.memory_space<vmem>>, vector<4x512xf32>
    tpu.vector_store %arg9[%c20, %c0_112], %186 {strides = array<i32>} : memref<36x512xf32, #tpu.memory_space<vmem>>, vector<4x512xf32>,
    %c497_i32_113 = arith.constant 497 : i32
    %188 = tpu.dynamic_rotate %156 by %c497_i32_113 dim 1 : vector<4x512xf32>, i32 -> vector<4x512xf32>
    %c6_114 = arith.constant 6 : index
    %c0_115 = arith.constant 0 : index
    %c0_116 = arith.constant 0 : index
    %189 = vector.load %arg6[%c6_114, %c0_115, %c0_116] : memref<9x1x512xf32, #tpu.memory_space<vmem>>, vector<1x1x512xf32>
    %190 = vector.shape_cast %189 : vector<1x1x512xf32> to vector<1x512xf32>
    %191 = vector.broadcast %190 : vector<1x512xf32> to vector<4x512xf32>
    %192 = arith.mulf %188, %191 : vector<4x512xf32>
    %c24 = arith.constant 24 : index
    %c0_117 = arith.constant 0 : index
    %193 = vector.load %arg9[%c24, %c0_117] : memref<36x512xf32, #tpu.memory_space<vmem>>, vector<4x512xf32>
    tpu.vector_store %arg9[%c24, %c0_117], %192 {strides = array<i32>} : memref<36x512xf32, #tpu.memory_space<vmem>>, vector<4x512xf32>,
    %c496_i32_118 = arith.constant 496 : i32
    %194 = tpu.dynamic_rotate %156 by %c496_i32_118 dim 1 : vector<4x512xf32>, i32 -> vector<4x512xf32>
    %c7_119 = arith.constant 7 : index
    %c0_120 = arith.constant 0 : index
    %c0_121 = arith.constant 0 : index
    %195 = vector.load %arg6[%c7_119, %c0_120, %c0_121] : memref<9x1x512xf32, #tpu.memory_space<vmem>>, vector<1x1x512xf32>
    %196 = vector.shape_cast %195 : vector<1x1x512xf32> to vector<1x512xf32>
    %197 = vector.broadcast %196 : vector<1x512xf32> to vector<4x512xf32>
    %198 = arith.mulf %194, %197 : vector<4x512xf32>
    %c28 = arith.constant 28 : index
    %c0_122 = arith.constant 0 : index
    %199 = vector.load %arg9[%c28, %c0_122] : memref<36x512xf32, #tpu.memory_space<vmem>>, vector<4x512xf32>
    tpu.vector_store %arg9[%c28, %c0_122], %198 {strides = array<i32>} : memref<36x512xf32, #tpu.memory_space<vmem>>, vector<4x512xf32>,
    %c495_i32_123 = arith.constant 495 : i32
    %200 = tpu.dynamic_rotate %156 by %c495_i32_123 dim 1 : vector<4x512xf32>, i32 -> vector<4x512xf32>
    %c8_124 = arith.constant 8 : index
    %c0_125 = arith.constant 0 : index
    %c0_126 = arith.constant 0 : index
    %201 = vector.load %arg6[%c8_124, %c0_125, %c0_126] : memref<9x1x512xf32, #tpu.memory_space<vmem>>, vector<1x1x512xf32>
    %202 = vector.shape_cast %201 : vector<1x1x512xf32> to vector<1x512xf32>
    %203 = vector.broadcast %202 : vector<1x512xf32> to vector<4x512xf32>
    %204 = arith.mulf %200, %203 : vector<4x512xf32>
    %c32 = arith.constant 32 : index
    %c0_127 = arith.constant 0 : index
    %205 = vector.load %arg9[%c32, %c0_127] : memref<36x512xf32, #tpu.memory_space<vmem>>, vector<4x512xf32>
    tpu.vector_store %arg9[%c32, %c0_127], %204 {strides = array<i32>} : memref<36x512xf32, #tpu.memory_space<vmem>>, vector<4x512xf32>,
    %c0_128 = arith.constant 0 : index
    %c0_129 = arith.constant 0 : index
    %206 = vector.load %arg9[%c0_128, %c0_129] : memref<36x512xf32, #tpu.memory_space<vmem>>, vector<36x512xf32>
    %cst_130 = arith.constant dense<0.000000e+00> : vector<8x512xf32>
    %207 = tpu.matmul %66, %206, %cst_130 {dimension_numbers = #tpu.dot_dimension_numbers<[1], [0], [0], [1], [0, 0, 1, 1], [], []>} : vector<8x36xf32>, vector<36x512xf32>, vector<8x512xf32> -> vector<8x512xf32>
    %208 = vector.broadcast %71 : f32 to vector<8x512xf32>
    %209 = arith.mulf %207, %208 : vector<8x512xf32>
    %210 = vector.extract_strided_slice %209 {offsets = [0, 0], sizes = [8, 256], strides = [1, 1]} : vector<8x512xf32> to vector<8x256xf32>
    %c0_131 = arith.constant 0 : index
    %c0_132 = arith.constant 0 : index
    %c0_133 = arith.constant 0 : index
    %211 = vector.load %arg8[%c0_131, %c0_132, %c0_133] : memref<2x8x256xf32, #tpu.memory_space<vmem>>, vector<1x8x256xf32>
    %212 = vector.shape_cast %211 : vector<1x8x256xf32> to vector<8x256xf32>
    %213 = vector.shape_cast %210 : vector<8x256xf32> to vector<1x8x256xf32>
    tpu.vector_store %arg8[%c0_131, %c0_132, %c0_133], %213 {strides = array<i32>} : memref<2x8x256xf32, #tpu.memory_space<vmem>>, vector<1x8x256xf32>,
    %214 = vector.extract_strided_slice %209 {offsets = [0, 256], sizes = [8, 256], strides = [1, 1]} : vector<8x512xf32> to vector<8x256xf32>
    %c1_134 = arith.constant 1 : index
    %c0_135 = arith.constant 0 : index
    %c0_136 = arith.constant 0 : index
    %215 = vector.load %arg8[%c1_134, %c0_135, %c0_136] : memref<2x8x256xf32, #tpu.memory_space<vmem>>, vector<1x8x256xf32>
    %216 = vector.shape_cast %215 : vector<1x8x256xf32> to vector<8x256xf32>
    %217 = vector.shape_cast %214 : vector<8x256xf32> to vector<1x8x256xf32>
    tpu.vector_store %arg8[%c1_134, %c0_135, %c0_136], %217 {strides = array<i32>} : memref<2x8x256xf32, #tpu.memory_space<vmem>>, vector<1x8x256xf32>,
    return
  }
}

</mosaic_0001>

<bundles_post_ra>
// kernel: attn_conv2d_forward.1
= control target key start
LH: loop header
LB: loop body
LE: loop exit
PB: predicated region body
PF: predicated region fallthrough
CT: control target
= control target key end

     0   :  { %vm69_vm0 = vcmask 1041408   ;;  %v1355_v2 = vmov 0   ;;  %vm44_vm1 = vcmask 408576   ;;  %s1356_s29 = smov 17   ;;  %s1357_s10 = smov 16   ;;  %vm204_vm6 = vcmask 523264   ;;  %s2214_s0 = inlined_call_operand.vmem [shape: f32[50,36], index: 0, kind: input, shape index: {}]   ;;  %s2215_s4 = inlined_call_operand.vmem [shape: f32[9,4,1], index: 4, kind: input, shape index: {}]   ;;  %s2216_s5 = inlined_call_operand.vmem [shape: f32[4,512], index: 5, kind: input, shape index: {}]   ;;  %s2217_s2 = inlined_call_operand.vmem [shape: f32[64,50], index: 2, kind: input, shape index: {}]   ;;  %s2218_s3 = inlined_call_operand.vmem [shape: f32[50,64], index: 3, kind: input, shape index: {}]   ;;  %s2219_s1 = inlined_call_operand.vmem [shape: f32[72,50], index: 1, kind: input, shape index: {}]   ;;  %s2220_s6 = inlined_call_operand.vmem [shape: f32[9,1,512], index: 6, kind: input, shape index: {}]   ;;  %s2221_s7 = inlined_call_operand.vmem [shape: f32[9,1,36], index: 7, kind: input, shape index: {}]   ;;  %s2222_s8 = inlined_call_operand.vmem [shape: f32[2,8,256], index: 8, kind: output, shape index: {}]  }
   0x1   :  { %v43_v0 = vld [vmem:[%s2214_s0 + $0x30] sm:$0x3]  ;;  %v42_v1 = vld [vmem:[%s2214_s0 + $0x28] sm:$0xff]  ;;  %1340 = vset.pattern.permute.xlu1 %v1355_v2  ;;  %1339 = vset.pattern.permute.xlu2 %v1355_v2  ;;  %v430_v3 = vld [vmem:[%s2215_s4] sm:$0xf]  ;;  %s1358_s13 = smov 15  }
   0x2   :  { %1248 = vmatpush.msk.msra.mxu0 %vm69_vm0, %v43_v0  ;;  %1341 = vset.pattern.permute.xlu0 %v1355_v2  ;;  %v41_v4 = vld [vmem:[%s2214_s0 + $0x20] sm:$0xff]  ;;  %v1430_v6 = vld [vmem:[%s2216_s5 + $0x8] sm:$0xff]  ;;  %v40_v7 = vld [vmem:[%s2214_s0 + $0x18] sm:$0xff]  ;;  %s1360_s21 = smov 127   ;;  %s1362_s9 = smov 112   ;;  %vm1141_vm11 = vcmask 1043456  }
   0x3   :  { %447 = vperm.xlu1 %1340, %v430_v3   ;;  %v1425_v5 = vld [vmem:[%s2216_s5] sm:$0xff]  ;;  %v1284_v8 = vld [vmem:[%s2215_s4 + $0x10] sm:$0xf]  ;;  %391 = vst [vmem:[#allocation1 + $0x10] ss:$2 sm:$0xff] %v1430_v6  ;;  %v38_v10 = vld [vmem:[%s2214_s0 + $0x8] sm:$0xff] }
   0x4   :  { %83 = vmatpush.msra.mxu0 %v42_v1  ;;  %389 = vst [vmem:[#allocation1] ss:$2 sm:$0xff] %v1425_v5  ;;  %384 = vperm.xlu2 %1339, %v1284_v8   ;;  %v39_v9 = vld [vmem:[%s2214_s0 + $0x10] sm:$0xff]  ;;  %v37_v11 = vld [vmem:[%s2214_s0] sm:$0xff]  ;;  %v30_v17 = vld [vmem:[%s2217_s2 + $0x8] sm:$0xff]  ;;  %s1361_s0 = smov 113  }
   0x5   :  { %v29_v12 = vld [vmem:[%s2217_s2] sm:$0xff]  ;;  %v31_v22 = vld [vmem:[%s2217_s2 + $0x10] sm:$0xff]  ;;  %v32_v27 = vld [vmem:[%s2217_s2 + $0x18] sm:$0xff]  ;;  %s1363_s20 = smov 111   ;;  %vm337_vm12 = vcmask 293888  }
   0x6   :  { %84 = vmatpush.msra.mxu0 %v41_v4  ;;  %v129_v30 = vld [vmem:[%s2218_s3 + $0x30] sm:$0x3]  ;;  %v128_v31 = vld [vmem:[%s2218_s3 + $0x28] sm:$0xff]  ;;  %v127_v34 = vld [vmem:[%s2218_s3 + $0x20] sm:$0xff] }
   0x7   :  { %1257 = vmatpush.msk.msra.mxu1 %vm69_vm0, %v129_v30  ;;  %v126_v35 = vld [vmem:[%s2218_s3 + $0x18] sm:$0xff]  ;;  %v1285_v36 = vld [vmem:[%s2215_s4 + $0x4] sm:$0xf]  ;;  %v125_v40 = vld [vmem:[%s2218_s3 + $0x10] sm:$0xff] }
   0x8   :  { %85 = vmatpush.msra.mxu0 %v40_v7  ;;  %v33_v37 = vld [vmem:[%s2217_s2 + $0x20] sm:$0xff]  ;;  %v124_v41 = vld [vmem:[%s2218_s3 + $0x8] sm:$0xff]  ;;  %v35_v53 = vld [vmem:[%s2217_s2 + $0x30] sm:$0xff] }
   0x9   :  { %170 = vmatpush.msra.mxu1 %v128_v31  ;;  %v123_v44 = vld [vmem:[%s2218_s3] sm:$0xff]  ;;  %v1287_v46 = vld [vmem:[%s2215_s4 + $0x8] sm:$0xf]  ;;  %s1359_s3 = smov 1   ;;  %v116_v56 = vld [vmem:[%s2219_s1 + $0x10] sm:$0xff] }
   0xa   :  { %86 = vmatpush.msra.mxu0 %v39_v9  ;;  %v1457_v15 = vld.sshfl [vmem:[#allocation1 + $0x10] sm:$0xff pattern:$0x75316420]  ;;  %v1459_v16 = vld.sshfl [vmem:[#allocation1 + $0x18] sm:$0xff pattern:$0x75316420] }
   0xb   :  { %v1452_v13 = vld.sshfl [vmem:[#allocation1] sm:$0xff pattern:$0x75316420]  ;;  %v1454_v14 = vld.sshfl [vmem:[#allocation1 + $0x8] sm:$0xff pattern:$0x75316420]  ;;  %171 = vmatpush.msra.mxu1 %v127_v34 }
   0xc   :  { %87 = vmatpush.msra.mxu0 %v38_v10  ;;  %404 = vst [vmem:[#allocation1] ss:$2 sm:$0xff] %v1425_v5  ;;  %v114_v45 = vld [vmem:[%s2219_s1] sm:$0xff]  ;;  %v34_v47 = vld [vmem:[%s2217_s2 + $0x28] sm:$0xff]  ;;  %v36_v57 = vld [vmem:[%s2217_s2 + $0x38] sm:$0xff] }
   0xd   :  { %406 = vst [vmem:[#allocation1 + $0x10] ss:$2 sm:$0xff] %v1430_v6  ;;  %172 = vmatpush.msra.mxu1 %v126_v35  ;;  %v115_v52 = vld [vmem:[%s2219_s1 + $0x8] sm:$0xff]  ;;  %v117_v62 = vld [vmem:[%s2219_s1 + $0x18] sm:$0xff]  ;;  %v118_v2 = vld [vmem:[%s2219_s1 + $0x20] sm:$0xff] }
   0xe   :  { %88 = vmatpush.msra.mxu0 %v37_v11  ;;  %v1289_v63 = vld [vmem:[%s2215_s4 + $0xc] sm:$0xf]  ;;  %v1291_v4 = vld [vmem:[%s2215_s4 + $0x14] sm:$0xf]  ;;  %v121_v9 = vld [vmem:[%s2219_s1 + $0x38] sm:$0xff] }
   0xf   :  { %1249 = vmatmul.msk.f32.vlgmr.msra.gmra.mxu0 %vm44_vm1, %v29_v12  ;;  %173 = vmatpush.msra.mxu1 %v125_v40  ;;  %v119_v3 = vld [vmem:[%s2219_s1 + $0x28] sm:$0xff] }
  0x11   :  { %174 = vmatpush.msra.mxu1 %v124_v41 }
  0x13   :  { %v408_v18 = vld.sshfl [vmem:[#allocation1 + $0x8] sm:$0xff pattern:$0x75316420]  ;;  %v407_v19 = vld.sshfl [vmem:[#allocation1] sm:$0xff pattern:$0x75316420]  ;;  %175 = vmatpush.msra.mxu1 %v123_v44 }
  0x14   :  { %417 = vrot.lane.b32.xlu1 %v408_v18, %s1356_s29  ;;  %415 = vrot.lane.b32.xlu0 %v407_v19, %s1356_s29  ;;  %458 = vst [vmem:[#allocation1] ss:$2 sm:$0xff] %v1425_v5  ;;  %v409_v20 = vld.sshfl [vmem:[#allocation1 + $0x10] sm:$0xff pattern:$0x75316420]  ;;  %v423_v19 = vlaneseq }
  0x15   :  { %v410_v21 = vld.sshfl [vmem:[#allocation1 + $0x18] sm:$0xff pattern:$0x75316420]  ;;  %419 = vrot.lane.b32.xlu2 %v409_v20, %s1356_s29  ;;  %1258 = vmatmul.msk.f32.vlgmr.msra.gmra.mxu1 %vm44_vm1, %v114_v45 }
  0x16   :  { %460 = vst [vmem:[#allocation1 + $0x10] ss:$2 sm:$0xff] %v1430_v6  ;;  %v1295_v18 = vld [vmem:[%s2215_s4 + $0x1c] sm:$0xf] }
  0x17   :  { %1250 = vmatmul.msk.f32.gmra.mxu0 %vm44_vm1, %v30_v17  ;;  %v122_v17 = vld [vmem:[%s2219_s1 + $0x40] sm:$0xff] }
  0x1b   :  { %v461_v23 = vld.sshfl [vmem:[#allocation1] sm:$0xff pattern:$0x75316420]  ;;  %v462_v24 = vld.sshfl [vmem:[#allocation1 + $0x8] sm:$0xff pattern:$0x75316420] }
  0x1c   :  { %421 = vrot.lane.b32.xlu1 %v410_v21, %s1356_s29  ;;  %512 = vst [vmem:[#allocation1] ss:$2 sm:$0xff] %v1425_v5  ;;  %v1297_v21 = vld [vmem:[%s2215_s4 + $0x20] sm:$0xf] }
  0x1d   :  { %v464_v25 = vld.sshfl [vmem:[#allocation1 + $0x18] sm:$0xff pattern:$0x75316420]  ;;  %v463_v26 = vld.sshfl [vmem:[#allocation1 + $0x10] sm:$0xff pattern:$0x75316420]  ;;  %469 = vrot.lane.b32.xlu2 %v461_v23, %s1357_s10  ;;  %1259 = vmatmul.msk.f32.gmra.mxu1 %vm44_vm1, %v115_v52 }
  0x1e   :  { %514 = vst [vmem:[#allocation1 + $0x10] ss:$2 sm:$0xff] %v1430_v6 }
  0x1f   :  { %1251 = vmatmul.msk.f32.gmra.mxu0 %vm44_vm1, %v31_v22 }
  0x23   :  { %v516_v28 = vld.sshfl [vmem:[#allocation1 + $0x8] sm:$0xff pattern:$0x75316420]  ;;  %v515_v29 = vld.sshfl [vmem:[#allocation1] sm:$0xff pattern:$0x75316420] }
  0x24   :  { %475 = vrot.lane.b32.xlu1 %v464_v25, %s1357_s10  ;;  %523 = vrot.lane.b32.xlu0 %v515_v29, %s1358_s13  ;;  %566 = vst [vmem:[#allocation1] ss:$2 sm:$0xff] %v1425_v5 }
  0x25   :  { %v518_v32 = vld.sshfl [vmem:[#allocation1 + $0x18] sm:$0xff pattern:$0x75316420]  ;;  %v517_v33 = vld.sshfl [vmem:[#allocation1 + $0x10] sm:$0xff pattern:$0x75316420]  ;;  %471 = vrot.lane.b32.xlu2 %v462_v24, %s1357_s10  ;;  %1260 = vmatmul.msk.f32.gmra.mxu1 %vm44_vm1, %v116_v56 }
  0x26   :  { %568 = vst [vmem:[#allocation1 + $0x10] ss:$2 sm:$0xff] %v1430_v6  ;;  %v1615_v24 = vand.u32 127, %v423_v19  ;;  %v1286_v56 = vld [vmem:[%s2220_s6 + $0x4] sm:$0xf] }
  0x27   :  { %1252 = vmatmul.msk.f32.gmra.mxu0 %vm44_vm1, %v32_v27 }
  0x28   :  { %vm477_vm2 = vcmp.lt.s32.totalorder %v1615_v24, 16  ;;  %vm425_vm3 = vcmp.lt.s32.totalorder %v1615_v24, 17  ;;  %vm531_vm4 = vcmp.lt.s32.totalorder %v1615_v24, 15  ;;  %vm585_vm5 = vcmp.lt.s32.totalorder %v1615_v24, 1 }
  0x29   :  { %vm639_vm7 = vcmp.lt.s32.totalorder %v1615_v24, 127  ;;  %vm693_vm8 = vcmp.lt.s32.totalorder %v1615_v24, 113  ;;  %vm747_vm9 = vcmp.lt.s32.totalorder %v1615_v24, 112  ;;  %vm801_vm10 = vcmp.lt.s32.totalorder %v1615_v24, 111 }
  0x2b   :  { %v569_v38 = vld.sshfl [vmem:[#allocation1] sm:$0xff pattern:$0x75316420]  ;;  %v570_v39 = vld.sshfl [vmem:[#allocation1 + $0x8] sm:$0xff pattern:$0x75316420] }
  0x2c   :  { %525 = vrot.lane.b32.xlu1 %v516_v28, %s1358_s13  ;;  %501 = vperm.xlu0 %1341, %v1285_v36   ;;  %620 = vst [vmem:[#allocation1] ss:$2 sm:$0xff] %v1425_v5 }
  0x2d   :  { %v571_v42 = vld.sshfl [vmem:[#allocation1 + $0x10] sm:$0xff pattern:$0x75316420]  ;;  %v572_v43 = vld.sshfl [vmem:[#allocation1 + $0x18] sm:$0xff pattern:$0x75316420]  ;;  %529 = vrot.lane.b32.xlu2 %v518_v32, %s1358_s13  ;;  %1261 = vmatmul.msk.f32.gmra.mxu1 %vm44_vm1, %v117_v62 }
  0x2e   :  { %622 = vst [vmem:[#allocation1 + $0x10] ss:$2 sm:$0xff] %v1430_v6 }
  0x2f   :  { %1253 = vmatmul.msk.f32.gmra.mxu0 %vm44_vm1, %v33_v37 }
  0x33   :  { %v623_v48 = vld.sshfl [vmem:[#allocation1] sm:$0xff pattern:$0x75316420]  ;;  %v624_v49 = vld.sshfl [vmem:[#allocation1 + $0x8] sm:$0xff pattern:$0x75316420] }
  0x34   :  { %473 = vrot.lane.b32.xlu1 %v463_v26, %s1357_s10  ;;  %555 = vperm.xlu0 %1341, %v1287_v46   ;;  %674 = vst [vmem:[#allocation1] ss:$2 sm:$0xff] %v1425_v5  ;;  %v1624_v26 = vld [vmem:[%s2220_s6] sm:$0xf] }
  0x35   :  { %v625_v50 = vld.sshfl [vmem:[#allocation1 + $0x10] sm:$0xff pattern:$0x75316420]  ;;  %v626_v51 = vld.sshfl [vmem:[#allocation1 + $0x18] sm:$0xff pattern:$0x75316420]  ;;  %577 = vrot.lane.b32.xlu2 %v569_v38, %s1359_s3  ;;  %1262 = vmatmul.msk.f32.gmra.mxu1 %vm44_vm1, %v118_v2 }
  0x36   :  { %676 = vst [vmem:[#allocation1 + $0x10] ss:$2 sm:$0xff] %v1430_v6  ;;  %v435_v28 = vperm.slane %v1624_v26, 2  ;;  %v434_v29 = vperm.slane %v1624_v26, 1  ;;  %v433_v44 = vperm.slane %v1624_v26, 0 }
  0x37   :  { %1254 = vmatmul.msk.f32.gmra.mxu0 %vm44_vm1, %v34_v47 }
  0x3b   :  { %v677_v54 = vld.sshfl [vmem:[#allocation1] sm:$0xff pattern:$0x75316420]  ;;  %v678_v55 = vld.sshfl [vmem:[#allocation1 + $0x8] sm:$0xff pattern:$0x75316420] }
  0x3c   :  { %579 = vrot.lane.b32.xlu1 %v570_v39, %s1359_s3  ;;  %633 = vrot.lane.b32.xlu0 %v624_v49, %s1360_s21  ;;  %728 = vst [vmem:[#allocation1] ss:$2 sm:$0xff] %v1425_v5 }
  0x3d   :  { %583 = vrot.lane.b32.xlu2 %v572_v43, %s1359_s3  ;;  %v679_v60 = vld.sshfl [vmem:[#allocation1 + $0x10] sm:$0xff pattern:$0x75316420]  ;;  %v680_v61 = vld.sshfl [vmem:[#allocation1 + $0x18] sm:$0xff pattern:$0x75316420]  ;;  %1263 = vmatmul.msk.f32.gmra.mxu1 %vm44_vm1, %v119_v3 }
  0x3e   :  { %730 = vst [vmem:[#allocation1 + $0x10] ss:$2 sm:$0xff] %v1430_v6  ;;  %v436_v43 = vperm.slane %v1624_v26, 3 }
  0x3f   :  { %1255 = vmatmul.msk.f32.gmra.mxu0 %vm44_vm1, %v35_v53 }
  0x43   :  { %v731_v58 = vld.sshfl [vmem:[#allocation1] sm:$0xff pattern:$0x75316420]  ;;  %v732_v59 = vld.sshfl [vmem:[#allocation1 + $0x8] sm:$0xff pattern:$0x75316420] }
  0x44   :  { %527 = vrot.lane.b32.xlu1 %v517_v33, %s1358_s13  ;;  %581 = vrot.lane.b32.xlu0 %v571_v42, %s1359_s3  ;;  %782 = vst [vmem:[#allocation1] ss:$2 sm:$0xff] %v1425_v5  ;;  %v1293_v5 = vld [vmem:[%s2215_s4 + $0x18] sm:$0xf] }
  0x45   :  { %631 = vrot.lane.b32.xlu2 %v623_v48, %s1360_s21  ;;  %v733_v0 = vld.sshfl [vmem:[#allocation1 + $0x10] sm:$0xff pattern:$0x75316420]  ;;  %v734_v1 = vld.sshfl [vmem:[#allocation1 + $0x18] sm:$0xff pattern:$0x75316420] }
  0x46   :  { %784 = vst [vmem:[#allocation1 + $0x10] ss:$2 sm:$0xff] %v1430_v6  ;;  %v120_v6 = vld [vmem:[%s2219_s1 + $0x30] sm:$0xff] }
  0x47   :  { %1256 = vmatmul.msk.f32.gmra.mxu0 %vm44_vm1, %v36_v57  ;;  %1264 = vmatmul.msk.f32.gmra.mxu1 %vm44_vm1, %v120_v6 }
  0x4b   :  { %v786_v7 = vld.sshfl [vmem:[#allocation1 + $0x8] sm:$0xff pattern:$0x75316420]  ;;  %v785_v10 = vld.sshfl [vmem:[#allocation1] sm:$0xff pattern:$0x75316420] }
  0x4c   :  { %635 = vrot.lane.b32.xlu1 %v625_v50, %s1360_s21  ;;  %689 = vrot.lane.b32.xlu0 %v679_v60, %s1361_s0 }
  0x4d   :  { %609 = vperm.xlu2 %1339, %v1289_v63   ;;  %v787_v12 = vld.sshfl [vmem:[#allocation1 + $0x10] sm:$0xff pattern:$0x75316420]  ;;  %v788_v22 = vld.sshfl [vmem:[#allocation1 + $0x18] sm:$0xff pattern:$0x75316420] }
  0x4f   :  { %1265 = vmatmul.msk.f32.gmra.mxu1 %vm44_vm1, %v121_v9 }
  0x54   :  { %685 = vrot.lane.b32.xlu1 %v677_v54, %s1361_s0  ;;  %739 = vrot.lane.b32.xlu0 %v731_v58, %s1362_s9  ;;  %v488_v58 = vperm.slane %v1286_v56, 1 }
  0x55   :  { %687 = vrot.lane.b32.xlu2 %v678_v55, %s1361_s0 }
  0x57   :  { %1266 = vmatmul.msk.f32.gmra.mxu1 %vm44_vm1, %v122_v17 }
  0x5c   :  { %663 = vperm.xlu1 %1340, %v1291_v4   ;;  %717 = vperm.xlu0 %1341, %v1293_v5  }
  0x5d   :  { %637 = vrot.lane.b32.xlu2 %v626_v51, %s1360_s21 }
  0x5e   :  { %v385_v8 = vpop.permute.xlu2 %384 }
  0x5f   :  { %v401_v34 = vmul.f32 %v1454_v14, %v385_v8  ;;  %v402_v35 = vmul.f32 %v1457_v15, %v385_v8  ;;  %v400_v47 = vmul.f32 %v1452_v13, %v385_v8  ;;  %v403_v48 = vmul.f32 %v1459_v16, %v385_v8 }
  0x64   :  { %741 = vrot.lane.b32.xlu1 %v732_v59, %s1362_s9  ;;  %795 = vrot.lane.b32.xlu0 %v786_v7, %s1363_s20  ;;  %v487_v59 = vperm.slane %v1286_v56, 0 }
  0x65   :  { %743 = vrot.lane.b32.xlu2 %v733_v0, %s1362_s9 }
  0x6c   :  { %691 = vrot.lane.b32.xlu1 %v680_v61, %s1361_s0  ;;  %745 = vrot.lane.b32.xlu0 %v734_v1, %s1362_s9  ;;  %v1288_v1 = vld [vmem:[%s2220_s6 + $0x8] sm:$0xf] }
  0x6d   :  { %793 = vrot.lane.b32.xlu2 %v785_v10, %s1363_s20  ;;  %v541_v4 = vperm.slane %v1288_v1, 0  ;;  %v542_v5 = vperm.slane %v1288_v1, 1 }
  0x6f   :  { %v420_v11 = vpop.permute.xlu2 %419 }
  0x74   :  { %797 = vrot.lane.b32.xlu1 %v787_v12, %s1363_s20 }
  0x75   :  { %771 = vperm.xlu2 %1339, %v1295_v18   ;;  %v448_v23 = vpop.permute.xlu1 %447 }
  0x77   :  { %v470_v20 = vpop.permute.xlu2 %469 }
  0x7c   :  { %825 = vperm.xlu1 %1340, %v1297_v21   ;;  %v490_v21 = vperm.slane %v1286_v56, 3 }
  0x7d   :  { %799 = vrot.lane.b32.xlu2 %v788_v22, %s1363_s20 }
  0x7f   :  { %v1619_v25 = vpop.permute.xlu2 %471 }
  0x80   :  { %v480_v27 = vsel %vm477_vm2, %v470_v20, %v1619_v25 }
  0x81   :  { %v496_v62 = vmul.f32 %v488_v58, %v480_v27 }
  0x86   :  { %v418_v30 = vpop.permute.xlu1 %417  ;;  %v416_v31 = vpop.permute.xlu0 %415 }
  0x87   :  { %v427_v32 = vsel %vm425_vm3, %v418_v30, %v420_v11  ;;  %v428_v33 = vsel %vm425_vm3, %v416_v31, %v418_v30  ;;  %v1642_v38 = vpop.permute.xlu2 %529 }
  0x88   :  { %v443_v36 = vmul.f32 %v435_v28, %v427_v32  ;;  %v442_v37 = vmul.f32 %v434_v29, %v428_v33 }
  0x8a   :  { %v452_v39 = vmul.f32 %v448_v23, %v443_v36  ;;  %v451_v40 = vmul.f32 %v448_v23, %v442_v37 }
  0x8c   :  { %v1644_v41 = vpop.f32.mrf.mxu0  ;;  %v456_v42 = vadd.f32 %v452_v39, %v402_v35  ;;  %v455_v14 = vadd.f32 %v451_v40, %v401_v34 }
  0x8e   :  { %v422_v45 = vpop.permute.xlu1 %421 }
  0x8f   :  { %v426_v15 = vsel %vm425_vm3, %v420_v11, %v422_v45  ;;  %v429_v46 = vsel %vm425_vm3, %v422_v45, %v416_v31  ;;  %v1658_v51 = vpop.permute.xlu2 %577 }
  0x90   :  { %v444_v49 = vmul.f32 %v436_v43, %v426_v15  ;;  %v441_v50 = vmul.f32 %v433_v44, %v429_v46 }
  0x92   :  { %v453_v52 = vmul.f32 %v448_v23, %v444_v49  ;;  %v450_v53 = vmul.f32 %v448_v23, %v441_v50  ;;  %v543_v50 = vperm.slane %v1288_v1, 2 }
  0x94   :  { %v1660_v54 = vpop.f32.mrf.mxu0  ;;  %v457_v55 = vadd.f32 %v453_v52, %v403_v48  ;;  %v454_v13 = vadd.f32 %v450_v53, %v400_v47  ;;  %v544_v52 = vperm.slane %v1288_v1, 3 }
  0x96   :  { %v476_v57 = vpop.permute.xlu1 %475  ;;  %v524_v16 = vpop.permute.xlu0 %523 }
  0x97   :  { %v481_v60 = vsel %vm477_vm2, %v476_v57, %v470_v20  ;;  %v1667_v61 = vpop.permute.xlu2 %583  ;;  %v535_v9 = vsel %vm531_vm4, %v1642_v38, %v524_v16  ;;  %v489_v20 = vperm.slane %v1286_v56, 2 }
  0x98   :  { %v495_v63 = vmul.f32 %v487_v59, %v481_v60  ;;  %v549_v17 = vmul.f32 %v541_v4, %v535_v9  ;;  %v1290_v9 = vld [vmem:[%s2220_s6 + $0xc] sm:$0xf] }
  0x9c   :  { %v1669_v0 = vpop.f32.mrf.mxu0 }
  0x9e   :  { %v526_v2 = vpop.permute.xlu1 %525  ;;  %v502_v3 = vpop.permute.xlu0 %501 }
  0x9f   :  { %v504_v6 = vmul.f32 %v502_v3, %v495_v63  ;;  %v505_v7 = vmul.f32 %v502_v3, %v496_v62  ;;  %v534_v8 = vsel %vm531_vm4, %v524_v16, %v526_v2  ;;  %v1680_v10 = vpop.permute.xlu2 %631 }
  0xa0   :  { %v550_v18 = vmul.f32 %v542_v5, %v534_v8 }
  0xa1   :  { %v508_v11 = vadd.f32 %v504_v6, %v454_v13  ;;  %v509_v12 = vadd.f32 %v505_v7, %v455_v14 }
  0xa4   :  { %v99_v19 = vpop.f32.mrf.mxu0 }
  0xa6   :  { %v474_v22 = vpop.permute.xlu1 %473  ;;  %v556_v23 = vpop.permute.xlu0 %555 }
  0xa7   :  { %v478_v27 = vsel %vm477_vm2, %v474_v22, %v476_v57  ;;  %v479_v30 = vsel %vm477_vm2, %v1619_v25, %v474_v22  ;;  %v558_v31 = vmul.f32 %v556_v23, %v549_v17  ;;  %v559_v32 = vmul.f32 %v556_v23, %v550_v18  ;;  %v1691_v37 = vpop.permute.xlu2 %609  ;;  %v177_v25 = vpop.f32.mrf.mxu1 }
  0xa8   :  { %v497_v33 = vmul.f32 %v489_v20, %v479_v30  ;;  %v498_v34 = vmul.f32 %v490_v21, %v478_v27  ;;  %v595_v17 = vperm.slane %v1290_v9, 0  ;;  %v589_v18 = vsel %vm585_vm5, %v1667_v61, %v1658_v51 }
  0xa9   :  { %v1687_v35 = vadd.f32 %v558_v31, %v508_v11  ;;  %v1689_v36 = vadd.f32 %v559_v32, %v509_v12  ;;  %v597_v30 = vperm.slane %v1290_v9, 2  ;;  %v598_v31 = vperm.slane %v1290_v9, 3 }
  0xaa   :  { %v506_v39 = vmul.f32 %v502_v3, %v497_v33  ;;  %v507_v40 = vmul.f32 %v502_v3, %v498_v34  ;;  %v603_v22 = vmul.f32 %v595_v17, %v589_v18 }
  0xac   :  { %v102_v14 = vpop.f32.mrf.mxu0  ;;  %v510_v45 = vadd.f32 %v506_v39, %v456_v42  ;;  %v511_v15 = vadd.f32 %v507_v40, %v457_v55 }
  0xae   :  { %v1693_v46 = vpop.permute.xlu1 %579  ;;  %v1695_v47 = vpop.permute.xlu0 %633 }
  0xaf   :  { %v1697_v49 = vpop.permute.xlu2 %687  ;;  %v1704_v55 = vpop.f32.mrf.mxu1 }
  0xb4   :  { %v105_v48 = vpop.f32.mrf.mxu0 }
  0xb6   :  { %v528_v53 = vpop.permute.xlu1 %527  ;;  %v582_v56 = vpop.permute.xlu0 %581 }
  0xb7   :  { %v532_v13 = vsel %vm531_vm4, %v528_v53, %v1642_v38  ;;  %v533_v42 = vsel %vm531_vm4, %v526_v2, %v528_v53  ;;  %v1710_v1 = vpop.permute.xlu2 %637  ;;  %v1714_v38 = vpop.f32.mrf.mxu1  ;;  %v587_v32 = vsel %vm585_vm5, %v1693_v46, %v582_v56 }
  0xb8   :  { %v551_v57 = vmul.f32 %v543_v50, %v533_v42  ;;  %v552_v16 = vmul.f32 %v544_v52, %v532_v13  ;;  %v1296_v13 = vld [vmem:[%s2220_s6 + $0x1c] sm:$0xf] }
  0xba   :  { %v560_v58 = vmul.f32 %v556_v23, %v551_v57  ;;  %v561_v59 = vmul.f32 %v556_v23, %v552_v16 }
  0xbc   :  { %v108_v60 = vpop.f32.mrf.mxu0  ;;  %v1706_v62 = vadd.f32 %v560_v58, %v510_v45  ;;  %v1708_v63 = vadd.f32 %v561_v59, %v511_v15  ;;  %v605_v15 = vmul.f32 %v597_v30, %v587_v32 }
  0xbe   :  { %v636_v3 = vpop.permute.xlu1 %635  ;;  %v1712_v4 = vpop.permute.xlu0 %689 }
  0xbf   :  { %v1720_v7 = vpop.permute.xlu2 %743  ;;  %v1722_v8 = vpop.f32.mrf.mxu1  ;;  %v641_v45 = vsel %vm639_vm7, %v1695_v47, %v636_v3  ;;  %v640_v50 = vsel %vm639_vm7, %v636_v3, %v1710_v1  ;;  %v695_v59 = vsel %vm693_vm8, %v1697_v49, %v1712_v4 }
  0xc4   :  { %v111_v5 = vpop.f32.mrf.mxu0 }
  0xc5   :  { %240 = vmatpush.msra.mxu2 %v111_v5  ;;  %1316 = vmatpush.msra.mxu3 %v111_v5 }
  0xc6   :  { %v1716_v2 = vpop.permute.xlu1 %685  ;;  %v1718_v6 = vpop.permute.xlu0 %739 }
  0xc7   :  { %241 = vmatpush.msra.mxu2 %v108_v60  ;;  %1317 = vmatpush.msra.mxu3 %v108_v60  ;;  %v1743_v20 = vpop.permute.xlu2 %793  ;;  %v1747_v21 = vpop.f32.mrf.mxu1  ;;  %v696_v53 = vsel %vm693_vm8, %v1716_v2, %v1697_v49  ;;  %v758_v49 = vperm.slane %v1296_v13, 1 }
  0xc9   :  { %242 = vmatpush.msra.mxu2 %v105_v48  ;;  %1318 = vmatpush.msra.mxu3 %v105_v48 }
  0xcb   :  { %243 = vmatpush.msra.mxu2 %v102_v14  ;;  %1319 = vmatpush.msra.mxu3 %v102_v14  ;;  %v612_v14 = vmul.f32 %v1691_v37, %v603_v22 }
  0xcd   :  { %244 = vmatpush.msra.mxu2 %v99_v19  ;;  %1320 = vmatpush.msra.mxu3 %v99_v19  ;;  %v1292_v19 = vld [vmem:[%s2220_s6 + $0x14] sm:$0xf]  ;;  %v616_v16 = vadd.f32 %v612_v14, %v1687_v35 }
  0xce   :  { %v1728_v11 = vpop.permute.xlu1 %663  ;;  %v1732_v12 = vpop.permute.xlu0 %717  ;;  %v649_v23 = vperm.slane %v1292_v19, 0  ;;  %v650_v27 = vperm.slane %v1292_v19, 1  ;;  %v651_v33 = vperm.slane %v1292_v19, 2  ;;  %v652_v48 = vperm.slane %v1292_v19, 3 }
  0xcf   :  { %245 = vmatpush.msra.mxu2 %v1669_v0  ;;  %1321 = vmatpush.msra.mxu3 %v1669_v0  ;;  %v596_v0 = vperm.slane %v1290_v9, 1  ;;  %v1790_v42 = vpop.f32.mrf.mxu1  ;;  %v1799_v60 = vpop.permute.xlu2 %771  ;;  %v757_v9 = vperm.slane %v1296_v13, 0 }
  0xd0   :  { %v658_v58 = vmul.f32 %v650_v27, %v641_v45  ;;  %v659_v3 = vmul.f32 %v651_v33, %v640_v50 }
  0xd1   :  { %246 = vmatpush.msra.mxu2 %v1660_v54  ;;  %1322 = vmatpush.msra.mxu3 %v1660_v54  ;;  %v588_v54 = vsel %vm585_vm5, %v1658_v51, %v1693_v46  ;;  %v1294_v51 = vld [vmem:[%s2220_s6 + $0x18] sm:$0xf] }
  0xd2   :  { %v604_v34 = vmul.f32 %v596_v0, %v588_v54  ;;  %v705_v17 = vperm.slane %v1294_v51, 2  ;;  %v706_v0 = vperm.slane %v1294_v51, 3  ;;  %v667_v54 = vmul.f32 %v1728_v11, %v658_v58 }
  0xd3   :  { %247 = vmatpush.msra.mxu2 %v1644_v41  ;;  %1323 = vmatpush.msra.mxu3 %v1644_v41  ;;  %v586_v41 = vsel %vm585_vm5, %v582_v56, %v1667_v61  ;;  %v642_v61 = vsel %vm639_vm7, %v1680_v10, %v1695_v47  ;;  %v704_v56 = vperm.slane %v1294_v51, 1  ;;  %v643_v47 = vsel %vm639_vm7, %v1710_v1, %v1680_v10 }
  0xd4   :  { %1267 = vmatmul.msk.f32.vlgmr.msra.gmra.mxu2 %vm204_vm6, %v177_v25  ;;  %v606_v46 = vmul.f32 %v598_v31, %v586_v41  ;;  %v703_v25 = vperm.slane %v1294_v51, 0  ;;  %v613_v52 = vmul.f32 %v1691_v37, %v604_v34  ;;  %v657_v57 = vmul.f32 %v649_v23, %v642_v61 }
  0xd5   :  { %v614_v10 = vmul.f32 %v1691_v37, %v605_v15  ;;  %v660_v35 = vmul.f32 %v652_v48, %v643_v47  ;;  %v712_v19 = vmul.f32 %v704_v56, %v695_v59  ;;  %v668_v31 = vmul.f32 %v1728_v11, %v659_v3 }
  0xd6   :  { %v742_v39 = vpop.permute.xlu1 %741  ;;  %v1765_v40 = vpop.permute.xlu0 %795  ;;  %v615_v1 = vmul.f32 %v1691_v37, %v606_v46  ;;  %v711_v5 = vmul.f32 %v703_v25, %v696_v53  ;;  %v617_v18 = vadd.f32 %v613_v52, %v1689_v36  ;;  %v759_v41 = vperm.slane %v1296_v13, 2 }
  0xd7   :  { %v618_v30 = vadd.f32 %v614_v10, %v1706_v62  ;;  %v669_v32 = vmul.f32 %v1728_v11, %v660_v35  ;;  %v760_v34 = vperm.slane %v1296_v13, 3  ;;  %v750_v62 = vsel %vm747_vm9, %v1718_v6, %v742_v39  ;;  %v1830_v14 = vpop.f32.mrf.mxu1  ;;  %v800_v53 = vpop.permute.xlu2 %799 }
  0xd8   :  { %v619_v36 = vadd.f32 %v615_v1, %v1708_v63  ;;  %v720_v51 = vmul.f32 %v1732_v12, %v711_v5  ;;  %v671_v45 = vadd.f32 %v667_v54, %v617_v18  ;;  %v721_v15 = vmul.f32 %v1732_v12, %v712_v19 }
  0xd9   :  { %v672_v25 = vadd.f32 %v668_v31, %v618_v30  ;;  %v765_v48 = vmul.f32 %v757_v9, %v750_v62  ;;  %v804_v10 = vsel %vm801_vm10, %v1743_v20, %v1765_v40  ;;  %v1938_v62 = vld [vmem:[%s2220_s6 + $0x1c] sm:$0xf] }
  0xda   :  { %v673_v56 = vadd.f32 %v669_v32, %v619_v36  ;;  %v725_v58 = vadd.f32 %v721_v15, %v671_v45 }
  0xdb   :  { %v774_v35 = vmul.f32 %v1799_v60, %v765_v48 }
  0xdc   :  { %1268 = vmatmul.msk.f32.gmra.mxu2 %vm204_vm6, %v1704_v55  ;;  %v666_v55 = vmul.f32 %v1728_v11, %v657_v57 }
  0xde   :  { %v692_v22 = vpop.permute.xlu1 %691  ;;  %v746_v27 = vpop.permute.xlu0 %745  ;;  %v670_v61 = vadd.f32 %v666_v55, %v616_v16 }
  0xdf   :  { %v694_v37 = vsel %vm693_vm8, %v1712_v4, %v692_v22  ;;  %v697_v23 = vsel %vm693_vm8, %v692_v22, %v1716_v2  ;;  %v1298_v4 = vld [vmem:[%s2220_s6 + $0x20] sm:$0xf]  ;;  %v749_v2 = vsel %vm747_vm9, %v742_v39, %v1720_v7  ;;  %v748_v11 = vsel %vm747_vm9, %v1720_v7, %v746_v27 }
  0xe0   :  { %v713_v33 = vmul.f32 %v705_v17, %v694_v37  ;;  %v714_v63 = vmul.f32 %v706_v0, %v697_v23  ;;  %v751_v46 = vsel %vm747_vm9, %v746_v27, %v1718_v6  ;;  %v811_v39 = vperm.slane %v1298_v4, 0 }
  0xe1   :  { %v766_v50 = vmul.f32 %v758_v49, %v749_v2  ;;  %v767_v52 = vmul.f32 %v759_v41, %v748_v11  ;;  %v812_v13 = vperm.slane %v1298_v4, 1  ;;  %v724_v16 = vadd.f32 %v720_v51, %v670_v61  ;;  %v198_v49 = vpop.f32.mrf.mxu1 }
  0xe2   :  { %v722_v7 = vmul.f32 %v1732_v12, %v713_v33  ;;  %v723_v47 = vmul.f32 %v1732_v12, %v714_v63  ;;  %v813_v59 = vperm.slane %v1298_v4, 2  ;;  %v814_v6 = vperm.slane %v1298_v4, 3 }
  0xe3   :  { %v805_v12 = vsel %vm801_vm10, %v800_v53, %v1743_v20  ;;  %v775_v9 = vmul.f32 %v1799_v60, %v766_v50  ;;  %v776_v17 = vmul.f32 %v1799_v60, %v767_v52  ;;  %v819_v0 = vmul.f32 %v811_v39, %v804_v10  ;;  %v1959_v39 = vld [vmem:[%s2220_s6 + $0x20] sm:$0xf] }
  0xe4   :  { %1269 = vmatmul.msk.f32.gmra.mxu2 %vm204_vm6, %v1714_v38  ;;  %v768_v38 = vmul.f32 %v760_v34, %v751_v46  ;;  %v726_v5 = vadd.f32 %v722_v7, %v672_v25  ;;  %v727_v18 = vadd.f32 %v723_v47, %v673_v56  ;;  %v822_v55 = vmul.f32 %v814_v6, %v805_v12  ;;  %v1954_v25 = vld [vmem:[%s2220_s6 + $0x14] sm:$0xf] }
  0xe5   :  { %v778_v54 = vadd.f32 %v774_v35, %v724_v16  ;;  %v779_v20 = vadd.f32 %v775_v9, %v725_v58  ;;  %v1060_v63 = vperm.slane %v1938_v62, 0  ;;  %v988_v50 = vperm.slane %v1954_v25, 0 }
  0xe6   :  { %v798_v57 = vpop.permute.xlu1 %797  ;;  %v777_v19 = vmul.f32 %v1799_v60, %v768_v38  ;;  %v780_v37 = vadd.f32 %v776_v17, %v726_v5  ;;  %v1102_v7 = vperm.slane %v1959_v39, 0  ;;  %v1103_v6 = vperm.slane %v1959_v39, 1 }
  0xe7   :  { %v803_v1 = vsel %vm801_vm10, %v1765_v40, %v798_v57  ;;  %v802_v3 = vsel %vm801_vm10, %v798_v57, %v800_v53 }
  0xe8   :  { %v820_v40 = vmul.f32 %v812_v13, %v803_v1  ;;  %v821_v22 = vmul.f32 %v813_v59, %v802_v3  ;;  %v781_v23 = vadd.f32 %v777_v19, %v727_v18  ;;  %v1977_v59 = vld [vmem:[%s2220_s6 + $0x18] sm:$0xf]  ;;  %v1997_v19 = vld [vmem:[%s2220_s6 + $0x4] sm:$0xf] }
  0xe9   :  { %v201_v4 = vpop.f32.mrf.mxu1  ;;  %v1030_v10 = vperm.slane %v1977_v59, 0 }
  0xea   :  { %1275 = vmatmul.msk.f32.vlgmr.msra.gmra.mxu3 %vm204_vm6, %v201_v4 }
  0xec   :  { %1270 = vmatmul.msk.f32.gmra.mxu2 %vm204_vm6, %v1722_v8 }
  0xee   :  { %v826_v27 = vpop.permute.xlu1 %825 }
  0xef   :  { %v828_v30 = vmul.f32 %v826_v27, %v819_v0  ;;  %v829_v36 = vmul.f32 %v826_v27, %v820_v40  ;;  %v830_v31 = vmul.f32 %v826_v27, %v821_v22  ;;  %v831_v41 = vmul.f32 %v826_v27, %v822_v55 }
  0xf0   :  { %v870_v40 = vperm.slane %v1997_v19, 0 }
  0xf1   :  { %v1859_v32 = vadd.f32 %v828_v30, %v778_v54  ;;  %v1861_v60 = vadd.f32 %v829_v36, %v779_v20  ;;  %v1863_v51 = vadd.f32 %v830_v31, %v780_v37  ;;  %v1865_v33 = vadd.f32 %v831_v41, %v781_v23  ;;  %v1343_v20 = vld [vmem:[%s2221_s7 + $0x1] ss:$0 sm:$0xff]  ;;  %v1342_v31 = vld [vmem:[%s2221_s7] ss:$0 sm:$0xff]  ;;  %v1344_v41 = vld [vmem:[%s2221_s7 + $0x2] ss:$0 sm:$0xff] }
  0xf3   :  { %970 = vst [vmem:[#allocation2 + $0x8] sm:$0xf] %v1859_v32  ;;  %1048 = vrot.lane.b32.xlu1 %v1861_v60, %s1362_s9  ;;  %1088 = vrot.lane.b32.xlu2 %v1859_v32, %s1363_s20 }
  0xf4   :  { %971 = vst [vmem:[#allocation2 + $0x88] sm:$0xf] %v1861_v60  ;;  %1046 = vrot.lane.b32.xlu0 %v1859_v32, %s1362_s9  ;;  %1271 = vmatmul.msk.f32.gmra.mxu2 %vm204_vm6, %v1747_v21 }
  0xf5   :  { %972 = vst [vmem:[#allocation2 + $0x28] sm:$0xf] %v1863_v51 }
  0xf6   :  { %973 = vst [vmem:[#allocation2 + $0x40] sm:$0xf] %v1865_v33 }
  0xfb   :  { %974 = vrot.lane.b32.xlu1 %v1859_v32, %s1360_s21  ;;  %976 = vrot.lane.b32.xlu2 %v1861_v60, %s1360_s21 }
  0xfc   :  { %1090 = vrot.lane.b32.xlu0 %v1861_v60, %s1363_s20  ;;  %1272 = vmatmul.msk.f32.gmra.mxu2 %vm204_vm6, %v1790_v42 }
 0x103   :  { %1018 = vrot.lane.b32.xlu1 %v1861_v60, %s1361_s0  ;;  %928 = vrot.lane.b32.xlu2 %v1859_v32, %s1359_s3 }
 0x104   :  { %1016 = vrot.lane.b32.xlu0 %v1859_v32, %s1361_s0  ;;  %1273 = vmatmul.msk.f32.gmra.mxu2 %vm204_vm6, %v1830_v14 }
 0x10b   :  { %856 = vrot.lane.b32.xlu1 %v1859_v32, %s1357_s10  ;;  %862 = vrot.lane.b32.xlu2 %v1865_v33, %s1357_s10 }
 0x10c   :  { %1274 = vmatmul.msk.f32.gmra.mxu2 %vm204_vm6, %v198_v49  ;;  %v2002_v49 = vld [vmem:[%s2220_s6 + $0xc] sm:$0xf] }
 0x10d   :  { %v943_v22 = vperm.slane %v2002_v49, 1 }
 0x113   :  { %904 = vrot.lane.b32.xlu1 %v1865_v33, %s1358_s13  ;;  %836 = vrot.lane.b32.xlu2 %v1859_v32, %s1356_s29 }
 0x11b   :  { %1092 = vrot.lane.b32.xlu2 %v1863_v51, %s1363_s20  ;;  %1050 = vrot.lane.b32.xlu1 %v1863_v51, %s1362_s9 }
 0x123   :  { %930 = vrot.lane.b32.xlu2 %v1861_v60, %s1359_s3  ;;  %1020 = vrot.lane.b32.xlu1 %v1863_v51, %s1361_s0 }
 0x12b   :  { %838 = vrot.lane.b32.xlu2 %v1861_v60, %s1356_s29  ;;  %900 = vrot.lane.b32.xlu1 %v1861_v60, %s1358_s13 }
 0x133   :  { %980 = vrot.lane.b32.xlu2 %v1865_v33, %s1360_s21  ;;  %1094 = vrot.lane.b32.xlu1 %v1865_v33, %s1363_s20 }
 0x13b   :  { %860 = vrot.lane.b32.xlu2 %v1863_v51, %s1357_s10  ;;  %932 = vrot.lane.b32.xlu1 %v1863_v51, %s1359_s3 }
 0x143   :  { %840 = vrot.lane.b32.xlu1 %v1863_v51, %s1356_s29 }
 0x14d   :  { %v1927_v8 = vpop.permute.xlu2 %1088 }
 0x155   :  { %v1929_v21 = vpop.permute.xlu2 %976 }
 0x157   :  { %v1931_v42 = vpop.f32.mrf.mxu2 }
 0x15d   :  { %v1933_v34 = vpop.permute.xlu2 %928 }
 0x15f   :  { %v252_v2 = vpop.f32.mrf.mxu2 }
 0x165   :  { %v1941_v11 = vpop.permute.xlu1 %1048  ;;  %v1943_v14 = vpop.permute.xlu2 %862 }
 0x166   :  { %v1945_v61 = vpop.permute.xlu0 %1046 }
 0x167   :  { %v255_v45 = vpop.f32.mrf.mxu2  ;;  %v1056_v15 = vsel %vm747_vm9, %v1945_v61, %v1941_v11 }
 0x168   :  { %v1068_v46 = vmul.f32 %v1060_v63, %v1056_v15 }
 0x16a   :  { %v1076_v48 = vrot.slane %v1068_v46, 4  ;;  %v286_v46 = vmul.f32 %v1343_v20, %v252_v2 }
 0x16c   :  { %1084 = vst [vmem:[#allocation2 + $0x58] sm:$0xf0] %v1076_v48  ;;  %v1345_v48 = vld [vmem:[%s2221_s7 + $0x3] ss:$0 sm:$0xff] }
 0x16d   :  { %v1963_v52 = vpop.permute.xlu1 %974  ;;  %v1965_v53 = vpop.permute.xlu2 %836 }
 0x16e   :  { %v984_v56 = vsel %vm639_vm7, %v1963_v52, %v1929_v21  ;;  %v1091_v47 = vpop.permute.xlu0 %1090  ;;  %v273_v20 = vpop.f32.mrf.mxu3 }
 0x16f   :  { %v258_v13 = vpop.f32.mrf.mxu2  ;;  %v996_v57 = vmul.f32 %v988_v50, %v984_v56  ;;  %v1098_v38 = vsel %vm801_vm10, %v1927_v8, %v1091_v47  ;;  %v293_v56 = vmul.f32 %v1344_v41, %v255_v45 }
 0x170   :  { %v1110_v16 = vmul.f32 %v1102_v7, %v1098_v38  ;;  %v280_v7 = vmul.f32 %v1342_v31, %v1931_v42 }
 0x171   :  { %v1004_v58 = vrot.slane %v996_v57, 4 }
 0x172   :  { %1114 = vst [vmem:[#allocation2 + $0x20] sm:$0xf] %v1110_v16  ;;  %v287_v2 = vadd.f32 %v286_v46, %v280_v7  ;;  %v300_v16 = vmul.f32 %v1345_v48, %v258_v13 }
 0x173   :  { %1012 = vst [vmem:[#allocation2 + $0x8] sm:$0xf0] %v1004_v58  ;;  %v1347_v58 = vld [vmem:[%s2221_s7 + $0x5] ss:$0 sm:$0xff] }
 0x175   :  { %v1981_v1 = vpop.permute.xlu1 %1018  ;;  %v1983_v3 = vpop.permute.xlu2 %1092 }
 0x176   :  { %v1985_v12 = vpop.permute.xlu0 %1016  ;;  %v1097_v5 = vsel %vm801_vm10, %v1091_v47, %v1983_v3  ;;  %v1346_v47 = vld [vmem:[%s2221_s7 + $0x4] ss:$0 sm:$0xff] }
 0x177   :  { %v1026_v35 = vsel %vm693_vm8, %v1985_v12, %v1981_v1  ;;  %v1111_v9 = vmul.f32 %v1103_v6, %v1097_v5  ;;  %v261_v17 = vpop.f32.mrf.mxu2 }
 0x178   :  { %v1038_v18 = vmul.f32 %v1030_v10, %v1026_v35  ;;  %v294_v10 = vadd.f32 %v293_v56, %v287_v2  ;;  %v307_v5 = vmul.f32 %v1346_v47, %v261_v17  ;;  %v1348_v35 = vld [vmem:[%s2221_s7 + $0x6] ss:$0 sm:$0xff]  ;;  %v1350_v17 = vld [vmem:[%s2221_s7 + $0x8] ss:$0 sm:$0xff]  ;;  %v1031_v56 = vperm.slane %v1977_v59, 1 }
 0x179   :  { %1115 = vst [vmem:[#allocation2 + $0x48] sm:$0xf] %v1111_v9  ;;  %v1134_v0 = vld [vmem:[#allocation2 + $0x20] sm:$0xf]  ;;  %v335_v46 = vmul.f32 %v1350_v17, %v273_v20  ;;  %v873_v47 = vperm.slane %v1997_v19, 3 }
 0x17a   :  { %1042 = vst [vmem:[#allocation2 + $0x58] sm:$0xf] %v1038_v18  ;;  %1306 = vmatpush.msk.msrb.mxu3 %vm1141_vm11, %v1134_v0  ;;  %v1126_v50 = vld [vmem:[#allocation2 + $0x8] sm:$0xff]  ;;  %v301_v13 = vadd.f32 %v300_v16, %v294_v10  ;;  %v1061_v18 = vperm.slane %v1938_v62, 1  ;;  %v991_v0 = vperm.slane %v1954_v25, 3 }
 0x17d   :  { %v2007_v55 = vpop.permute.xlu1 %856  ;;  %v2009_v54 = vpop.permute.xlu2 %930 }
 0x17e   :  { %v867_v37 = vsel %vm477_vm2, %v1943_v14, %v2007_v55  ;;  %v938_v23 = vsel %vm585_vm5, %v1933_v34, %v2009_v54 }
 0x17f   :  { %v878_v27 = vmul.f32 %v870_v40, %v867_v37  ;;  %v951_v30 = vmul.f32 %v943_v22, %v938_v23  ;;  %v264_v36 = vpop.f32.mrf.mxu2  ;;  %v308_v40 = vadd.f32 %v307_v5, %v301_v13 }
 0x180   :  { %v314_v9 = vmul.f32 %v1347_v58, %v264_v36 }
 0x181   :  { %v886_v4 = vrot.slane %v878_v27, 4  ;;  %v959_v63 = vrot.slane %v951_v30, 4  ;;  %v1130_v15 = vld [vmem:[#allocation2 + $0x58] sm:$0xff] }
 0x182   :  { %1166 = vmatpush.msrb.mxu3 %v1130_v15  ;;  %v315_v27 = vadd.f32 %v314_v9, %v308_v40  ;;  %v944_v40 = vperm.slane %v2002_v49, 2 }
 0x183   :  { %894 = vst [vmem:[#allocation2] sm:$0xf0] %v886_v4 }
 0x184   :  { %967 = vst [vmem:[#allocation2 + $0x68] sm:$0xf0] %v959_v63  ;;  %1167 = vmatpush.msrb.mxu3 %v1126_v50 }
 0x185   :  { %v2035_v57 = vpop.permute.xlu1 %904  ;;  %v2037_v38 = vpop.permute.xlu2 %838 }
 0x186   :  { %v846_v42 = vsel %vm425_vm3, %v1965_v53, %v2037_v38 }
 0x187   :  { %v849_v45 = vmul.f32 %v846_v42, %v434_v29  ;;  %v267_v6 = vpop.f32.mrf.mxu2  ;;  %v1349_v29 = vld [vmem:[%s2221_s7 + $0x7] ss:$0 sm:$0xff] }
 0x188   :  { %v321_v22 = vmul.f32 %v1348_v35, %v267_v6  ;;  %v1104_v35 = vperm.slane %v1959_v39, 2 }
 0x189   :  { %853 = vst [vmem:[#allocation2 + $0x38] sm:$0xf] %v849_v45 }
 0x18a   :  { %v322_v63 = vadd.f32 %v321_v22, %v315_v27 }
 0x18d   :  { %v2059_v37 = vpop.permute.xlu1 %1050  ;;  %v2061_v23 = vpop.permute.xlu2 %980 }
 0x18e   :  { %v1055_v30 = vsel %vm747_vm9, %v1941_v11, %v2059_v37  ;;  %v985_v36 = vsel %vm639_vm7, %v2061_v23, %v1963_v52 }
 0x18f   :  { %v1069_v31 = vmul.f32 %v1061_v18, %v1055_v30  ;;  %v999_v41 = vmul.f32 %v991_v0, %v985_v36  ;;  %v270_v4 = vpop.f32.mrf.mxu2 }
 0x190   :  { %v328_v15 = vmul.f32 %v1349_v29, %v270_v4 }
 0x191   :  { %v1077_v48 = vrot.slane %v1069_v31, 4  ;;  %v1007_v50 = vrot.slane %v999_v41, 4  ;;  %v942_v31 = vperm.slane %v2002_v49, 0 }
 0x192   :  { %v329_v7 = vadd.f32 %v328_v15, %v322_v63  ;;  %v2134_v15 = vld [vmem:[%s2220_s6 + $0x8] sm:$0xf] }
 0x193   :  { %1085 = vst [vmem:[#allocation2 + $0x10] sm:$0xf0] %v1077_v48 }
 0x194   :  { %1015 = vst [vmem:[#allocation2 + $0x40] sm:$0xf0] %v1007_v50  ;;  %v2073_v11 = vadd.f32 %v335_v46, %v329_v7  ;;  %v913_v50 = vperm.slane %v2134_v15, 1 }
 0x195   :  { %v2075_v2 = vpop.permute.xlu1 %1020  ;;  %v2077_v52 = vpop.permute.xlu2 %860 }
 0x196   :  { %v1025_v16 = vsel %vm693_vm8, %v1981_v1, %v2075_v2  ;;  %v864_v58 = vsel %vm477_vm2, %v2077_v52, %v1943_v14  ;;  %v338_v42 = vsel %vm337_vm12, %v2073_v11, -inf  ;;  %v1105_v1 = vperm.slane %v1959_v39, 3 }
 0x197   :  { %v1039_v45 = vmul.f32 %v1031_v56, %v1025_v16  ;;  %v881_v6 = vmul.f32 %v873_v47, %v864_v58  ;;  %339 = vmax.xlane.f32.xlu0 %v338_v42 }
 0x199   :  { %1043 = vst [vmem:[#allocation2 + $0x10] sm:$0xf] %v1039_v45  ;;  %v889_v10 = vrot.slane %v881_v6, 4 }
 0x19b   :  { %897 = vst [vmem:[#allocation2 + $0x18] sm:$0xf0] %v889_v10 }
 0x19d   :  { %v2089_v5 = vpop.permute.xlu1 %900 }
 0x1a5   :  { %v1095_v13 = vpop.permute.xlu1 %1094 }
 0x1a6   :  { %v1096_v14 = vsel %vm801_vm10, %v1983_v3, %v1095_v13  ;;  %v1099_v9 = vsel %vm801_vm10, %v1095_v13, %v1927_v8  ;;  %v990_v13 = vperm.slane %v1954_v25, 2 }
 0x1a7   :  { %v1112_v18 = vmul.f32 %v1104_v35, %v1096_v14  ;;  %v1113_v0 = vmul.f32 %v1105_v1, %v1099_v9  ;;  %v989_v1 = vperm.slane %v1954_v25, 1  ;;  %v1131_v25 = vld [vmem:[#allocation2 + $0x10] sm:$0xff] }
 0x1a9   :  { %1116 = vst [vmem:[#allocation2 + $0x70] sm:$0xf] %v1112_v18 }
 0x1aa   :  { %1117 = vst [vmem:[#allocation2 + $0x90] sm:$0xf] %v1113_v0 }
 0x1ab   :  { %934 = vrot.lane.b32.xlu0 %v1865_v33, %s1359_s3 }
 0x1ad   :  { %v933_v22 = vpop.permute.xlu1 %932 }
 0x1ae   :  { %v937_v39 = vsel %vm585_vm5, %v2009_v54, %v933_v22 }
 0x1af   :  { %v952_v29 = vmul.f32 %v944_v40, %v937_v39  ;;  %v1135_v40 = vld [vmem:[#allocation2 + $0x48] sm:$0xf]  ;;  %v872_v39 = vperm.slane %v1997_v19, 2 }
 0x1b1   :  { %v960_v3 = vrot.slane %v952_v29, 4 }
 0x1b3   :  { %968 = vst [vmem:[#allocation2 + $0x78] sm:$0xf0] %v960_v3  ;;  %898 = vrot.lane.b32.xlu0 %v1859_v32, %s1358_s13 }
 0x1b5   :  { %v841_v8 = vpop.permute.xlu1 %840 }
 0x1b6   :  { %v845_v20 = vsel %vm425_vm3, %v2037_v38, %v841_v8 }
 0x1b7   :  { %v850_v17 = vmul.f32 %v845_v20, %v435_v28 }
 0x1b9   :  { %854 = vst [vmem:[#allocation2 + $0x50] sm:$0xf] %v850_v17 }
 0x1bb   :  { %842 = vrot.lane.b32.xlu0 %v1865_v33, %s1356_s29 }
 0x1c3   :  { %978 = vrot.lane.b32.xlu0 %v1863_v51, %s1360_s21 }
 0x1cb   :  { %858 = vrot.lane.b32.xlu0 %v1861_v60, %s1357_s10  ;;  %v945_v60 = vperm.slane %v2002_v49, 3  ;;  %v912_v49 = vperm.slane %v2134_v15, 0 }
 0x1d3   :  { %1052 = vrot.lane.b32.xlu0 %v1865_v33, %s1362_s9 }
 0x1db   :  { %1022 = vrot.lane.b32.xlu0 %v1865_v33, %s1361_s0 }
 0x1e3   :  { %902 = vrot.lane.b32.xlu0 %v1863_v51, %s1358_s13 }
 0x20a   :  { %v340_v28 = vpop.xlane.xlu0 %339 }
 0x20b   :  { %v341_v32 = vrot.slane %v340_v28, 4 }
 0x20d   :  { %v342_v54 = vmax.f32 %v340_v28, %v341_v32  ;;  %v1063_v32 = vperm.slane %v1938_v62, 3 }
 0x20f   :  { %v343_v38 = vrot.slane %v342_v54, 2 }
 0x211   :  { %v344_v27 = vmax.f32 %v342_v54, %v343_v38 }
 0x213   :  { %v345_v30 = vrot.slane %v344_v27, 1 }
 0x215   :  { %v346_v36 = vmax.f32 %v344_v27, %v345_v30 }
 0x217   :  { %1324 = vpush %v346_v36 }
 0x21d   :  { %v935_v41 = vpop.permute.xlu0 %934 }
 0x21e   :  { %v936_v4 = vsel %vm585_vm5, %v933_v22, %v935_v41  ;;  %v939_v51 = vsel %vm585_vm5, %v935_v41, %v1933_v34  ;;  %v871_v22 = vperm.slane %v1997_v19, 1  ;;  %v1062_v19 = vperm.slane %v1938_v62, 2 }
 0x21f   :  { %v950_v33 = vmul.f32 %v942_v31, %v939_v51  ;;  %v953_v63 = vmul.f32 %v945_v60, %v936_v4  ;;  %v1032_v4 = vperm.slane %v1977_v59, 2  ;;  %v1033_v51 = vperm.slane %v1977_v59, 3 }
 0x220   :  { %v915_v59 = vperm.slane %v2134_v15, 3 }
 0x221   :  { %v958_v46 = vrot.slane %v950_v33, 4  ;;  %v961_v48 = vrot.slane %v953_v63, 4 }
 0x223   :  { %966 = vst [vmem:[#allocation2 + $0x30] sm:$0xf0] %v958_v46 }
 0x224   :  { %969 = vst [vmem:[#allocation2 + $0x80] sm:$0xf0] %v961_v48  ;;  %v914_v48 = vperm.slane %v2134_v15, 2 }
 0x225   :  { %v899_v7 = vpop.permute.xlu0 %898 }
 0x226   :  { %v908_v34 = vsel %vm531_vm4, %v899_v7, %v2089_v5  ;;  %v909_v56 = vsel %vm531_vm4, %v2035_v57, %v899_v7 }
 0x227   :  { %v920_v47 = vmul.f32 %v912_v49, %v909_v56  ;;  %v921_v16 = vmul.f32 %v913_v50, %v908_v34  ;;  %v1136_v50 = vld [vmem:[#allocation2 + $0x70] sm:$0xf] }
 0x229   :  { %924 = vst [vmem:[#allocation2 + $0x30] sm:$0xf] %v920_v47 }
 0x22a   :  { %925 = vst [vmem:[#allocation2 + $0x68] sm:$0xf] %v921_v16 }
 0x22d   :  { %v843_v58 = vpop.permute.xlu0 %842 }
 0x22e   :  { %v844_v42 = vsel %vm425_vm3, %v841_v8, %v843_v58  ;;  %v847_v45 = vsel %vm425_vm3, %v843_v58, %v1965_v53 }
 0x22f   :  { %v848_v6 = vmul.f32 %v847_v45, %v433_v44  ;;  %v851_v10 = vmul.f32 %v844_v42, %v436_v43 }
 0x230   :  { %v1122_v35 = vld [vmem:[#allocation2 + $0x30] sm:$0xff] }
 0x231   :  { %852 = vst [vmem:[#allocation2] sm:$0xf] %v848_v6  ;;  %1168 = vmatpush.msrb.mxu3 %v1122_v35  ;;  %v1123_v54 = vld [vmem:[#allocation2 + $0x68] sm:$0xff] }
 0x232   :  { %855 = vst [vmem:[#allocation2 + $0x18] sm:$0xf] %v851_v10 }
 0x235   :  { %v979_v14 = vpop.permute.xlu0 %978 }
 0x236   :  { %v982_v9 = vsel %vm639_vm7, %v979_v14, %v2061_v23  ;;  %v983_v44 = vsel %vm639_vm7, %v1929_v21, %v979_v14 }
 0x237   :  { %v997_v53 = vmul.f32 %v989_v1, %v983_v44  ;;  %v998_v26 = vmul.f32 %v990_v13, %v982_v9 }
 0x238   :  { %v1118_v43 = vld [vmem:[#allocation2] sm:$0xff] }
 0x239   :  { %v1005_v18 = vrot.slane %v997_v53, 4  ;;  %v1006_v0 = vrot.slane %v998_v26, 4  ;;  %1169 = vmatpush.msrb.mxu3 %v1118_v43  ;;  %v1121_v6 = vld [vmem:[#allocation2 + $0x18] sm:$0xff] }
 0x23b   :  { %1308 = vmatpush.msk.msra.mxu3 %vm1141_vm11, %v1135_v40  ;;  %1013 = vst [vmem:[#allocation2 + $0x88] sm:$0xf0] %v1005_v18 }
 0x23c   :  { %1014 = vst [vmem:[#allocation2 + $0x28] sm:$0xf0] %v1006_v0 }
 0x23d   :  { %1186 = vmatpush.msra.mxu3 %v1131_v25  ;;  %v859_v23 = vpop.permute.xlu0 %858 }
 0x23e   :  { %v865_v21 = vsel %vm477_vm2, %v859_v23, %v2077_v52  ;;  %v866_v29 = vsel %vm477_vm2, %v2007_v55, %v859_v23 }
 0x23f   :  { %v879_v3 = vmul.f32 %v871_v22, %v866_v29  ;;  %v880_v8 = vmul.f32 %v872_v39, %v865_v21 }
 0x241   :  { %v887_v20 = vrot.slane %v879_v3, 4  ;;  %v888_v17 = vrot.slane %v880_v8, 4 }
 0x242   :  { %v1127_v28 = vld [vmem:[#allocation2 + $0x88] sm:$0xff] }
 0x243   :  { %895 = vst [vmem:[#allocation2 + $0x38] sm:$0xf0] %v887_v20  ;;  %1187 = vmatpush.msra.mxu3 %v1127_v28  ;;  %v1128_v16 = vld [vmem:[#allocation2 + $0x28] sm:$0xff] }
 0x244   :  { %896 = vst [vmem:[#allocation2 + $0x50] sm:$0xf0] %v888_v17 }
 0x245   :  { %1188 = vmatpush.msra.mxu3 %v1123_v54  ;;  %v1053_v38 = vpop.permute.xlu0 %1052 }
 0x246   :  { %v1054_v52 = vsel %vm747_vm9, %v2059_v37, %v1053_v38  ;;  %v1057_v55 = vsel %vm747_vm9, %v1053_v38, %v1945_v61 }
 0x247   :  { %v1070_v27 = vmul.f32 %v1062_v19, %v1054_v52  ;;  %v1071_v30 = vmul.f32 %v1063_v32, %v1057_v55 }
 0x248   :  { %s1325_s6 = spop %1324 }
 0x249   :  { %v1078_v36 = vrot.slane %v1070_v27, 4  ;;  %v1079_v31 = vrot.slane %v1071_v30, 4  ;;  %v348_v60 = vstv %s1325_s6 }
 0x24a   :  { %v349_v62 = vsub.f32 %v2073_v11, %v348_v60  ;;  %v1119_v41 = vld [vmem:[#allocation2 + $0x38] sm:$0xff] }
 0x24b   :  { %1086 = vst [vmem:[#allocation2 + $0x98] sm:$0xf0] %v1078_v36  ;;  %1189 = vmatpush.msra.mxu3 %v1119_v41  ;;  %v1120_v42 = vld [vmem:[#allocation2 + $0x50] sm:$0xff] }
 0x24c   :  { %1087 = vst [vmem:[#allocation2 + $0x60] sm:$0xf0] %v1079_v31  ;;  %v350_v37 = vmul.f32 1.442695, %v349_v62 }
 0x24d   :  { %v1023_v33 = vpop.permute.xlu0 %1022 }
 0x24e   :  { %1351 = vpow2.f32 %v350_v37  ;;  %v1024_v61 = vsel %vm693_vm8, %v2075_v2, %v1023_v33  ;;  %v1027_v63 = vsel %vm693_vm8, %v1023_v33, %v1985_v12 }
 0x24f   :  { %v1040_v11 = vmul.f32 %v1032_v4, %v1024_v61  ;;  %v1041_v46 = vmul.f32 %v1033_v51, %v1027_v63 }
 0x251   :  { %1044 = vst [vmem:[#allocation2 + $0x98] sm:$0xf] %v1040_v11 }
 0x252   :  { %1045 = vst [vmem:[#allocation2 + $0x60] sm:$0xf] %v1041_v46 }
 0x254   :  { %v1352_v49 = vpop.eup %1351 }
 0x255   :  { %1307 = vmatmul.msk.f32.vlgmr.msrb.gmra.mxu3 %vm337_vm12, %v1352_v49  ;;  %v903_v7 = vpop.permute.xlu0 %902  ;;  %v352_v34 = vsel %vm337_vm12, %v1352_v49, 0.0 }
 0x256   :  { %1310 = vmatpush.msk.msrb.mxu3 %vm1141_vm11, %v1136_v50  ;;  %v906_v12 = vsel %vm531_vm4, %v903_v7, %v2035_v57  ;;  %v907_v2 = vsel %vm531_vm4, %v2089_v5, %v903_v7  ;;  %353 = vadd.xlane.f32.xlu2 %v352_v34  ;;  %v1137_v57 = vld [vmem:[#allocation2 + $0x90] sm:$0xf]  ;;  %v1129_v5 = vld [vmem:[#allocation2 + $0x40] sm:$0xff] }
 0x257   :  { %v922_v56 = vmul.f32 %v914_v48, %v907_v2  ;;  %v923_v15 = vmul.f32 %v915_v59, %v906_v12 }
 0x258   :  { %v1132_v47 = vld [vmem:[#allocation2 + $0x98] sm:$0xff] }
 0x259   :  { %926 = vst [vmem:[#allocation2 + $0x78] sm:$0xf] %v922_v56  ;;  %1206 = vmatpush.msrb.mxu3 %v1132_v47  ;;  %v1133_v24 = vld [vmem:[#allocation2 + $0x60] sm:$0xff] }
 0x25a   :  { %927 = vst [vmem:[#allocation2 + $0x80] sm:$0xf] %v923_v15 }
 0x25b   :  { %1207 = vmatpush.msrb.mxu3 %v1128_v16 }
 0x25d   :  { %1309 = vmatmul.msk.f32.vlgmr.msra.gmra.mxu3 %vm337_vm12, %v1352_v49 }
 0x260   :  { %v1124_v58 = vld [vmem:[#allocation2 + $0x78] sm:$0xff] }
 0x261   :  { %1208 = vmatpush.msrb.mxu3 %v1124_v58  ;;  %v1125_v45 = vld [vmem:[#allocation2 + $0x80] sm:$0xff] }
 0x263   :  { %1209 = vmatpush.msrb.mxu3 %v1120_v42 }
 0x265   :  { %1312 = vmatpush.msk.msra.mxu3 %vm1141_vm11, %v1137_v57 }
 0x266   :  { %1311 = vmatmul.msk.f32.vlgmr.msrb.gmra.mxu3 %vm337_vm12, %v1352_v49 }
 0x267   :  { %1226 = vmatpush.msra.mxu3 %v1133_v24 }
 0x269   :  { %1227 = vmatpush.msra.mxu3 %v1129_v5 }
 0x26b   :  { %1228 = vmatpush.msra.mxu3 %v1125_v45 }
 0x26d   :  { %1229 = vmatpush.msra.mxu3 %v1121_v6 }
 0x26e   :  { %1313 = vmatmul.msk.f32.vlgmr.msra.gmra.mxu3 %vm337_vm12, %v1352_v49 }
 0x2c9   :  { %v354_v10 = vpop.xlane.xlu2 %353 }
 0x2ca   :  { %v355_v35 = vrot.slane %v354_v10, 4 }
 0x2cc   :  { %v356_v1 = vadd.f32 %v355_v35, %v354_v10 }
 0x2ce   :  { %v357_v13 = vrot.slane %v356_v1, 2 }
 0x2d0   :  { %v358_v14 = vadd.f32 %v357_v13, %v356_v1 }
 0x2d2   :  { %v359_v9 = vrot.slane %v358_v14, 1 }
 0x2d4   :  { %v360_v44 = vadd.f32 %v359_v9, %v358_v14 }
 0x2d6   :  { %1326 = vpush %v360_v44 }
 0x2d8   :  { %v1171_v29 = vpop.f32.mrf.mxu3 }
 0x2e0   :  { %v1191_v3 = vpop.f32.mrf.mxu3 }
 0x2e9   :  { %v1211_v8 = vpop.f32.mrf.mxu3 }
 0x2f1   :  { %v1231_v17 = vpop.f32.mrf.mxu3 }
 0x307   :  { %s1327_s10 = spop %1326 }
 0x308   :  { %v362_v53 = vstv %s1327_s10 }
 0x309   :  { %1353 = vrcp.f32 %v362_v53  ;;  %v374_v0 = vand.u32 2147483648, %v362_v53  ;;  %v372_v25 = vand.u32 2147483647, %v362_v53  ;;  %vm368_vm14 = vweird.f32 %v362_v53 }
 0x30b   :  { %v375_v39 = vor.u32 1.1754944e-38, %v374_v0  ;;  %vm373_vm0 = vcmp.eq.f32.partialorder %v372_v25, 8.507059e+37 }
 0x30f   :  { %v1354_v26 = vpop.eup %1353 }
 0x310   :  { %v364_v43 = vmul.f32 %v1354_v26, %v362_v53  ;;  %vm369_vm13 = vweird.f32 %v1354_v26 }
 0x311   :  { %vm370_vm15 = vmor %vm368_vm14, %vm369_vm13 }
 0x312   :  { %v365_v18 = vsub.f32 1.0, %v364_v43 }
 0x314   :  { %v366_v40 = vmul.f32 %v1354_v26, %v365_v18 }
 0x316   :  { %v367_v22 = vadd.f32 %v1354_v26, %v366_v40 }
 0x318   :  { %v371_v23 = vsel %vm370_vm15, %v1354_v26, %v367_v22 }
 0x319   :  { %v376_v21 = vsel %vm373_vm0, %v375_v39, %v371_v23 }
 0x31a   :  { %1328 = vpush %v376_v21 }
 0x34b   :  { %s1329_s13 = spop %1328 }
 0x34c   :  { %v1234_v20 = vstv %s1329_s13 }
 0x34d   :  { %v1235_v28 = vmul.f32 %v1234_v20, %v1171_v29  ;;  %v1236_v19 = vmul.f32 %v1234_v20, %v1191_v3  ;;  %v1237_v32 = vmul.f32 %v1234_v20, %v1211_v8  ;;  %v1238_v54 = vmul.f32 %v1234_v20, %v1231_v17 }
 0x34f   :  { %1239 = vst [vmem:[%s2222_s8] sm:$0xff] %v1235_v28 }
 0x350   :  { %1240 = vst [vmem:[%s2222_s8 + $0x8] sm:$0xff] %v1236_v19 }
 0x351   :  { %1314 = vst [vmem:[%s2222_s8 + $0x10] sm:$0xff] %v1237_v32 }
 0x352   :  { %1315 = vst [vmem:[%s2222_s8 + $0x18] sm:$0xff] %v1238_v54 }

</bundles_post_ra>
